<compile_context>
chip_gen: v6e
topology: v6e:2x2x1
jax: 0.10.0
libtpu: 0.0.40
codegen_flags: <defaults>
</compile_context>

<pallas_src>
import jax
import jax.numpy as jnp
from jax.experimental import pallas as pl
from jax.experimental.pallas import tpu as pltpu

D = 128           # hidden width
D_OUT = 2         # final output width
N_LAYERS = 4
NEG_SLOPE = 0.01  # LeakyReLU slope
_SUB = 256        # rows per in-kernel sub-chunk (keeps f32 intermediates small)


def _leaky_relu(t):
    # For slope in (0,1): leaky_relu(t) == max(t, slope*t).
    return jnp.maximum(t, NEG_SLOPE * t)


def mlp_kernel(x_ref, w_ref, b_ref, o_ref):
    # x_ref: (tm, 128) f32 row tile (cast to compute dtype here, in-kernel)
    # w_ref: (4, 128, 128) stacked weights in compute dtype (layer 4 zero-padded)
    # b_ref: (4, 1, 128) stacked f32 biases (layer 4 zero-padded)
    # o_ref: (tm, 2) real output columns only
    tm = x_ref.shape[0]
    cdt = w_ref.dtype
    # Static Python loop over row sub-chunks: all 4 layers per sub-chunk so the
    # (chunk,128) intermediates stay in vregs instead of spilling to VMEM.
    for start in range(0, tm, _SUB):
        stop = min(start + _SUB, tm)
        h = x_ref[start:stop, :].astype(cdt)
        for l in range(N_LAYERS - 1):
            t = jnp.dot(h, w_ref[l],
                        preferred_element_type=jnp.float32) + b_ref[l]
            h = _leaky_relu(t).astype(cdt)
        t = jnp.dot(h, w_ref[N_LAYERS - 1],
                    preferred_element_type=jnp.float32) + b_ref[N_LAYERS - 1]
        o_ref[start:stop, :] = t[:, :D_OUT].astype(o_ref.dtype)


def _pick_tm(n_rows, tm_max=1024):
    """Row-tile size: multiple of 8; >= 2 balanced tiles (v7x megacore) when N
    is large enough; capped at tm_max to amortize per-grid-step overhead."""
    if n_rows <= _SUB:
        return -(-n_rows // 8) * 8
    n_tiles = max(2, -(-n_rows // tm_max))
    tm = -(-n_rows // n_tiles)       # balanced split across tiles
    tm = -(-tm // 128) * 128         # sublane/lane friendly
    return min(tm, tm_max)


def decoder_mlp(x, params, *, tm=None, compute_dtype=jnp.bfloat16):
    """x: (N, 128) float32.  Returns (N, 2) float32.

    compute_dtype: dtype fed to the MXU (bfloat16 is native on v5e/v6e/v7x and
    is the default fast path; jnp.float32 for same-device exactness checks).
    Accumulation / bias / LeakyReLU always stay float32.
    """
    (w1, b1), (w2, b2), (w3, b3), (w4, b4) = params
    N, d = x.shape
    assert d == D
    if tm is None:
        tm = _pick_tm(N)
    assert tm % 8 == 0

    # Pad last layer's weight/bias to lane width so all 4 layers stack uniformly.
    w4p = jnp.zeros((D, D), jnp.float32).at[:, :D_OUT].set(w4)
    b4p = jnp.zeros((D,), jnp.float32).at[:D_OUT].set(b4)

    w_all = jnp.stack([w1, w2, w3, w4p]).astype(compute_dtype)       # (4,D,D)
    b_all = jnp.stack([b1, b2, b3, b4p]).reshape(N_LAYERS, 1, D)     # (4,1,D)
    b_all = b_all.astype(jnp.float32)

    n_tiles = pl.cdiv(N, tm)         # ragged last block handled by Pallas masking

    w_item = jnp.dtype(compute_dtype).itemsize
    x_item = jnp.dtype(x.dtype).itemsize
    cost = pl.CostEstimate(
        flops=2 * N * D * (3 * D + D_OUT),
        transcendentals=0,
        bytes_accessed=(N * D * x_item             # x read
                        + N_LAYERS * D * D * w_item  # weights
                        + N_LAYERS * D * 4           # biases
                        + N * D_OUT * 4),            # output write
    )

    return pl.pallas_call(
        mlp_kernel,
        out_shape=jax.ShapeDtypeStruct((N, D_OUT), jnp.float32),
        grid_spec=pltpu.PrefetchScalarGridSpec(
            num_scalar_prefetch=0,
            grid=(n_tiles,),
            in_specs=[
                pl.BlockSpec((tm, D), lambda i: (i, 0)),              # x rows
                pl.BlockSpec((N_LAYERS, D, D), lambda i: (0, 0, 0)),  # stacked W
                pl.BlockSpec((N_LAYERS, 1, D), lambda i: (0, 0, 0)),  # stacked b
            ],
            out_specs=pl.BlockSpec((tm, D_OUT), lambda i: (i, 0)),
        ),
        compiler_params=pltpu.CompilerParams(
            dimension_semantics=("parallel",)),
        cost_estimate=cost,
    )(x, w_all, b_all)


def init_params(key):
    """Deterministic init matching torch.nn.Linear shapes.
    Weights are stored as (in, out) = PyTorch (out, in) transposed."""
    shapes = [(D, D), (D, D), (D, D), (D, D_OUT)]
    params = []
    for shp in shapes:
        key, kw, kb = jax.random.split(key, 3)
        bound = 1.0 / jnp.sqrt(shp[0])  # fan_in = in-features
        w = jax.random.uniform(kw, shp, jnp.float32, -bound, bound)
        b = jax.random.uniform(kb, (shp[1],), jnp.float32, -bound, bound)
        params.append((w, b))
    return params


def reference_mlp(x, params, compute_dtype=jnp.float32):
    """Pure-JAX reference emulating the same cast points as the kernel."""
    cd = compute_dtype
    h = x.astype(cd)
    n = len(params)
    for i, (w, b) in enumerate(params):
        t = jnp.dot(h, w.astype(cd), preferred_element_type=jnp.float32) + b
        if i < n - 1:
            h = jnp.maximum(t, NEG_SLOPE * t).astype(cd)
        else:
            return t


if __name__ == "__main__":
    key = jax.random.PRNGKey(0)
    key, kx = jax.random.split(key)

    # N not a multiple of the tile -> exercises the ragged (masked) last block;
    # >= 2 tiles -> both v7x TensorCores get work.
    N = 600
    x = jax.random.normal(kx, (N, D), jnp.float32)
    params = init_params(key)

    # Exact-cast f32 path (same-device parity with the JAX reference).
    out_f32 = jax.block_until_ready(
        decoder_mlp(x, params, compute_dtype=jnp.float32))
    ref_f32 = reference_mlp(x, params, jnp.float32)
    assert out_f32.shape == (N, D_OUT)
    assert jnp.allclose(out_f32, ref_f32, atol=1e-4, rtol=1e-4), "f32 mismatch"

    # Default fast path: bf16 MXU feed, f32 accumulate/bias/activation.
    out_bf16 = jax.block_until_ready(decoder_mlp(x, params))
    ref_bf16 = reference_mlp(x, params, jnp.bfloat16)
    assert out_bf16.shape == (N, D_OUT)
    assert jnp.allclose(out_bf16, ref_bf16, atol=5e-3, rtol=5e-3), "bf16 mismatch"

    print("KERNEL_OK")
</pallas_src>

<mosaic_0001>
module attributes {stable_mosaic.version = 11 : i64} {
  func.func @mlp_kernel(%arg0: i32, %arg1: memref<384x128xf32, #tpu.memory_space<vmem>>, %arg2: memref<4x128x128xf32, #tpu.memory_space<vmem>>, %arg3: memref<4x1x128xf32, #tpu.memory_space<vmem>>, %arg4: memref<384x2xf32, #tpu.memory_space<vmem>>) attributes {dimension_semantics = [#tpu.dimension_semantics<parallel>], iteration_bounds = array<i64: 2>, scalar_prefetch = 0 : i64, scratch_operands = 0 : i64, tpu.core_type = #tpu.core_type<tc>, window_params = [{transform_indices = @transform_0, window_bounds = array<i64: 384, 128>}, {pipeline_mode = #tpu.pipeline_mode<synchronous>, transform_indices = @transform_1, window_bounds = array<i64: 4, 128, 128>}, {pipeline_mode = #tpu.pipeline_mode<synchronous>, transform_indices = @transform_2, window_bounds = array<i64: 4, 1, 128>}, {transform_indices = @transform_3, window_bounds = array<i64: 384, 2>}]} {
    %c0 = arith.constant 0 : index
    %c0_0 = arith.constant 0 : index
    %0 = vector.load %arg1[%c0, %c0_0] : memref<384x128xf32, #tpu.memory_space<vmem>>, vector<256x128xf32>
    %c0_1 = arith.constant 0 : index
    %c0_2 = arith.constant 0 : index
    %c0_3 = arith.constant 0 : index
    %1 = vector.load %arg2[%c0_1, %c0_2, %c0_3] : memref<4x128x128xf32, #tpu.memory_space<vmem>>, vector<1x128x128xf32>
    %2 = vector.shape_cast %1 : vector<1x128x128xf32> to vector<128x128xf32>
    %cst = arith.constant dense<0.000000e+00> : vector<256x128xf32>
    %3 = tpu.matmul %0, %2, %cst {dimension_numbers = #tpu.dot_dimension_numbers<[1], [0], [0], [1], [0, 0, 1, 1], [], []>} : vector<256x128xf32>, vector<128x128xf32>, vector<256x128xf32> -> vector<256x128xf32>
    %c0_4 = arith.constant 0 : index
    %c0_5 = arith.constant 0 : index
    %c0_6 = arith.constant 0 : index
    %4 = vector.load %arg3[%c0_4, %c0_5, %c0_6] : memref<4x1x128xf32, #tpu.memory_space<vmem>>, vector<1x1x128xf32>
    %5 = vector.shape_cast %4 : vector<1x1x128xf32> to vector<1x128xf32>
    %6 = vector.broadcast %5 : vector<1x128xf32> to vector<256x128xf32>
    %7 = arith.addf %3, %6 : vector<256x128xf32>
    %cst_7 = arith.constant 0.00999999977 : f32
    %8 = vector.broadcast %cst_7 : f32 to vector<256x128xf32>
    %9 = arith.mulf %8, %7 : vector<256x128xf32>
    %10 = arith.maximumf %7, %9 : vector<256x128xf32>
    %c1 = arith.constant 1 : index
    %c0_8 = arith.constant 0 : index
    %c0_9 = arith.constant 0 : index
    %11 = vector.load %arg2[%c1, %c0_8, %c0_9] : memref<4x128x128xf32, #tpu.memory_space<vmem>>, vector<1x128x128xf32>
    %12 = vector.shape_cast %11 : vector<1x128x128xf32> to vector<128x128xf32>
    %cst_10 = arith.constant dense<0.000000e+00> : vector<256x128xf32>
    %13 = tpu.matmul %10, %12, %cst_10 {dimension_numbers = #tpu.dot_dimension_numbers<[1], [0], [0], [1], [0, 0, 1, 1], [], []>} : vector<256x128xf32>, vector<128x128xf32>, vector<256x128xf32> -> vector<256x128xf32>
    %c1_11 = arith.constant 1 : index
    %c0_12 = arith.constant 0 : index
    %c0_13 = arith.constant 0 : index
    %14 = vector.load %arg3[%c1_11, %c0_12, %c0_13] : memref<4x1x128xf32, #tpu.memory_space<vmem>>, vector<1x1x128xf32>
    %15 = vector.shape_cast %14 : vector<1x1x128xf32> to vector<1x128xf32>
    %16 = vector.broadcast %15 : vector<1x128xf32> to vector<256x128xf32>
    %17 = arith.addf %13, %16 : vector<256x128xf32>
    %cst_14 = arith.constant 0.00999999977 : f32
    %18 = vector.broadcast %cst_14 : f32 to vector<256x128xf32>
    %19 = arith.mulf %18, %17 : vector<256x128xf32>
    %20 = arith.maximumf %17, %19 : vector<256x128xf32>
    %c2 = arith.constant 2 : index
    %c0_15 = arith.constant 0 : index
    %c0_16 = arith.constant 0 : index
    %21 = vector.load %arg2[%c2, %c0_15, %c0_16] : memref<4x128x128xf32, #tpu.memory_space<vmem>>, vector<1x128x128xf32>
    %22 = vector.shape_cast %21 : vector<1x128x128xf32> to vector<128x128xf32>
    %cst_17 = arith.constant dense<0.000000e+00> : vector<256x128xf32>
    %23 = tpu.matmul %20, %22, %cst_17 {dimension_numbers = #tpu.dot_dimension_numbers<[1], [0], [0], [1], [0, 0, 1, 1], [], []>} : vector<256x128xf32>, vector<128x128xf32>, vector<256x128xf32> -> vector<256x128xf32>
    %c2_18 = arith.constant 2 : index
    %c0_19 = arith.constant 0 : index
    %c0_20 = arith.constant 0 : index
    %24 = vector.load %arg3[%c2_18, %c0_19, %c0_20] : memref<4x1x128xf32, #tpu.memory_space<vmem>>, vector<1x1x128xf32>
    %25 = vector.shape_cast %24 : vector<1x1x128xf32> to vector<1x128xf32>
    %26 = vector.broadcast %25 : vector<1x128xf32> to vector<256x128xf32>
    %27 = arith.addf %23, %26 : vector<256x128xf32>
    %cst_21 = arith.constant 0.00999999977 : f32
    %28 = vector.broadcast %cst_21 : f32 to vector<256x128xf32>
    %29 = arith.mulf %28, %27 : vector<256x128xf32>
    %30 = arith.maximumf %27, %29 : vector<256x128xf32>
    %c3 = arith.constant 3 : index
    %c0_22 = arith.constant 0 : index
    %c0_23 = arith.constant 0 : index
    %31 = vector.load %arg2[%c3, %c0_22, %c0_23] : memref<4x128x128xf32, #tpu.memory_space<vmem>>, vector<1x128x128xf32>
    %32 = vector.shape_cast %31 : vector<1x128x128xf32> to vector<128x128xf32>
    %cst_24 = arith.constant dense<0.000000e+00> : vector<256x128xf32>
    %33 = tpu.matmul %30, %32, %cst_24 {dimension_numbers = #tpu.dot_dimension_numbers<[1], [0], [0], [1], [0, 0, 1, 1], [], []>} : vector<256x128xf32>, vector<128x128xf32>, vector<256x128xf32> -> vector<256x128xf32>
    %c3_25 = arith.constant 3 : index
    %c0_26 = arith.constant 0 : index
    %c0_27 = arith.constant 0 : index
    %34 = vector.load %arg3[%c3_25, %c0_26, %c0_27] : memref<4x1x128xf32, #tpu.memory_space<vmem>>, vector<1x1x128xf32>
    %35 = vector.shape_cast %34 : vector<1x1x128xf32> to vector<1x128xf32>
    %36 = vector.broadcast %35 : vector<1x128xf32> to vector<256x128xf32>
    %37 = arith.addf %33, %36 : vector<256x128xf32>
    %38 = vector.extract_strided_slice %37 {offsets = [0, 0], sizes = [256, 2], strides = [1, 1]} : vector<256x128xf32> to vector<256x2xf32>
    %c0_28 = arith.constant 0 : index
    %c0_29 = arith.constant 0 : index
    %39 = vector.load %arg4[%c0_28, %c0_29] : memref<384x2xf32, #tpu.memory_space<vmem>>, vector<256x2xf32>
    tpu.vector_store %arg4[%c0_28, %c0_29], %38 {strides = array<i32>} : memref<384x2xf32, #tpu.memory_space<vmem>>, vector<256x2xf32>,
    %c256 = arith.constant 256 : index
    %c0_30 = arith.constant 0 : index
    %40 = vector.load %arg1[%c256, %c0_30] : memref<384x128xf32, #tpu.memory_space<vmem>>, vector<128x128xf32>
    %c0_31 = arith.constant 0 : index
    %c0_32 = arith.constant 0 : index
    %c0_33 = arith.constant 0 : index
    %41 = vector.load %arg2[%c0_31, %c0_32, %c0_33] : memref<4x128x128xf32, #tpu.memory_space<vmem>>, vector<1x128x128xf32>
    %42 = vector.shape_cast %41 : vector<1x128x128xf32> to vector<128x128xf32>
    %cst_34 = arith.constant dense<0.000000e+00> : vector<128x128xf32>
    %43 = tpu.matmul %40, %42, %cst_34 {dimension_numbers = #tpu.dot_dimension_numbers<[1], [0], [0], [1], [0, 0, 1, 1], [], []>} : vector<128x128xf32>, vector<128x128xf32>, vector<128x128xf32> -> vector<128x128xf32>
    %c0_35 = arith.constant 0 : index
    %c0_36 = arith.constant 0 : index
    %c0_37 = arith.constant 0 : index
    %44 = vector.load %arg3[%c0_35, %c0_36, %c0_37] : memref<4x1x128xf32, #tpu.memory_space<vmem>>, vector<1x1x128xf32>
    %45 = vector.shape_cast %44 : vector<1x1x128xf32> to vector<1x128xf32>
    %46 = vector.broadcast %45 : vector<1x128xf32> to vector<128x128xf32>
    %47 = arith.addf %43, %46 : vector<128x128xf32>
    %cst_38 = arith.constant 0.00999999977 : f32
    %48 = vector.broadcast %cst_38 : f32 to vector<128x128xf32>
    %49 = arith.mulf %48, %47 : vector<128x128xf32>
    %50 = arith.maximumf %47, %49 : vector<128x128xf32>
    %c1_39 = arith.constant 1 : index
    %c0_40 = arith.constant 0 : index
    %c0_41 = arith.constant 0 : index
    %51 = vector.load %arg2[%c1_39, %c0_40, %c0_41] : memref<4x128x128xf32, #tpu.memory_space<vmem>>, vector<1x128x128xf32>
    %52 = vector.shape_cast %51 : vector<1x128x128xf32> to vector<128x128xf32>
    %cst_42 = arith.constant dense<0.000000e+00> : vector<128x128xf32>
    %53 = tpu.matmul %50, %52, %cst_42 {dimension_numbers = #tpu.dot_dimension_numbers<[1], [0], [0], [1], [0, 0, 1, 1], [], []>} : vector<128x128xf32>, vector<128x128xf32>, vector<128x128xf32> -> vector<128x128xf32>
    %c1_43 = arith.constant 1 : index
    %c0_44 = arith.constant 0 : index
    %c0_45 = arith.constant 0 : index
    %54 = vector.load %arg3[%c1_43, %c0_44, %c0_45] : memref<4x1x128xf32, #tpu.memory_space<vmem>>, vector<1x1x128xf32>
    %55 = vector.shape_cast %54 : vector<1x1x128xf32> to vector<1x128xf32>
    %56 = vector.broadcast %55 : vector<1x128xf32> to vector<128x128xf32>
    %57 = arith.addf %53, %56 : vector<128x128xf32>
    %cst_46 = arith.constant 0.00999999977 : f32
    %58 = vector.broadcast %cst_46 : f32 to vector<128x128xf32>
    %59 = arith.mulf %58, %57 : vector<128x128xf32>
    %60 = arith.maximumf %57, %59 : vector<128x128xf32>
    %c2_47 = arith.constant 2 : index
    %c0_48 = arith.constant 0 : index
    %c0_49 = arith.constant 0 : index
    %61 = vector.load %arg2[%c2_47, %c0_48, %c0_49] : memref<4x128x128xf32, #tpu.memory_space<vmem>>, vector<1x128x128xf32>
    %62 = vector.shape_cast %61 : vector<1x128x128xf32> to vector<128x128xf32>
    %cst_50 = arith.constant dense<0.000000e+00> : vector<128x128xf32>
    %63 = tpu.matmul %60, %62, %cst_50 {dimension_numbers = #tpu.dot_dimension_numbers<[1], [0], [0], [1], [0, 0, 1, 1], [], []>} : vector<128x128xf32>, vector<128x128xf32>, vector<128x128xf32> -> vector<128x128xf32>
    %c2_51 = arith.constant 2 : index
    %c0_52 = arith.constant 0 : index
    %c0_53 = arith.constant 0 : index
    %64 = vector.load %arg3[%c2_51, %c0_52, %c0_53] : memref<4x1x128xf32, #tpu.memory_space<vmem>>, vector<1x1x128xf32>
    %65 = vector.shape_cast %64 : vector<1x1x128xf32> to vector<1x128xf32>
    %66 = vector.broadcast %65 : vector<1x128xf32> to vector<128x128xf32>
    %67 = arith.addf %63, %66 : vector<128x128xf32>
    %cst_54 = arith.constant 0.00999999977 : f32
    %68 = vector.broadcast %cst_54 : f32 to vector<128x128xf32>
    %69 = arith.mulf %68, %67 : vector<128x128xf32>
    %70 = arith.maximumf %67, %69 : vector<128x128xf32>
    %c3_55 = arith.constant 3 : index
    %c0_56 = arith.constant 0 : index
    %c0_57 = arith.constant 0 : index
    %71 = vector.load %arg2[%c3_55, %c0_56, %c0_57] : memref<4x128x128xf32, #tpu.memory_space<vmem>>, vector<1x128x128xf32>
    %72 = vector.shape_cast %71 : vector<1x128x128xf32> to vector<128x128xf32>
    %cst_58 = arith.constant dense<0.000000e+00> : vector<128x128xf32>
    %73 = tpu.matmul %70, %72, %cst_58 {dimension_numbers = #tpu.dot_dimension_numbers<[1], [0], [0], [1], [0, 0, 1, 1], [], []>} : vector<128x128xf32>, vector<128x128xf32>, vector<128x128xf32> -> vector<128x128xf32>
    %c3_59 = arith.constant 3 : index
    %c0_60 = arith.constant 0 : index
    %c0_61 = arith.constant 0 : index
    %74 = vector.load %arg3[%c3_59, %c0_60, %c0_61] : memref<4x1x128xf32, #tpu.memory_space<vmem>>, vector<1x1x128xf32>
    %75 = vector.shape_cast %74 : vector<1x1x128xf32> to vector<1x128xf32>
    %76 = vector.broadcast %75 : vector<1x128xf32> to vector<128x128xf32>
    %77 = arith.addf %73, %76 : vector<128x128xf32>
    %78 = vector.extract_strided_slice %77 {offsets = [0, 0], sizes = [128, 2], strides = [1, 1]} : vector<128x128xf32> to vector<128x2xf32>
    %c256_62 = arith.constant 256 : index
    %c0_63 = arith.constant 0 : index
    %79 = vector.load %arg4[%c256_62, %c0_63] : memref<384x2xf32, #tpu.memory_space<vmem>>, vector<128x2xf32>
    tpu.vector_store %arg4[%c256_62, %c0_63], %78 {strides = array<i32>} : memref<384x2xf32, #tpu.memory_space<vmem>>, vector<128x2xf32>,
    return
  }
  func.func @transform_0(%arg0: i32) -> (i32, i32) {
    %c0_i32 = arith.constant 0 : i32
    %c0_i32_0 = arith.constant 0 : i32
    return %arg0, %c0_i32 : i32, i32
  }
  func.func @transform_1(%arg0: i32) -> (i32, i32, i32) {
    %c0_i32 = arith.constant 0 : i32
    %c0_i32_0 = arith.constant 0 : i32
    %c0_i32_1 = arith.constant 0 : i32
    %c0_i32_2 = arith.constant 0 : i32
    return %c0_i32, %c0_i32_0, %c0_i32_1 : i32, i32, i32
  }
  func.func @transform_2(%arg0: i32) -> (i32, i32, i32) {
    %c0_i32 = arith.constant 0 : i32
    %c0_i32_0 = arith.constant 0 : i32
    %c0_i32_1 = arith.constant 0 : i32
    %c0_i32_2 = arith.constant 0 : i32
    return %c0_i32, %c0_i32_0, %c0_i32_1 : i32, i32, i32
  }
  func.func @transform_3(%arg0: i32) -> (i32, i32) {
    %c0_i32 = arith.constant 0 : i32
    %c0_i32_0 = arith.constant 0 : i32
    return %arg0, %c0_i32 : i32, i32
  }
}

</mosaic_0001>

<bundles_post_ra>
// kernel: tpu_custom_call.1
= control target key start
LH: loop header
LB: loop body
LE: loop exit
PB: predicated region body
PF: predicated region fallthrough
CT: control target
= control target key end

     0   :  { %8 = vsyncpa [#allocation3], 0  ;;  %s4707_s0 = inlined_call_operand.hbm [shape: f32[600,128], index: 0, kind: input, shape index: {}]   ;;  %s4708_s1 = inlined_call_operand.hbm [shape: f32[4,128,128], index: 1, kind: input, shape index: {}]   ;;  %s4709_s2 = inlined_call_operand.hbm [shape: f32[4,1,128], index: 2, kind: input, shape index: {}]   ;;  %s4710_s3 = inlined_call_operand.vmem [shape: f32[600,2], index: 3, kind: output, shape index: {}]  }
   0x1   :  { %10 = vsyncpa [#allocation3 + $0x1], 0 }
   0x2   :  { %11 = vsyncpa [#allocation5], 0  ;;  %s3962_s12 = smov 0   ;;  %s3964_s13 = smov 0  }
   0x3   :  { %s3966_s14 = smov 0   ;;  %s3968_s15 = smov 0  }
   0x4 LB: > { %s3981_s16 = sadd.s32 4294967295, %s3899_s15   ;;  %s3984_s17 = sadd.s32 1, %s3899_s15   ;;  %s3899_s15 = sphi %s3968_s15, %s4730_s15   ;;  %s3895_s14 = sphi %s3966_s14, %s4729_s14   ;;  %s3891_s13 = sphi %s3964_s13, %s4728_s13   ;;  %s3887_s12 = sphi %s3962_s12, %s4727_s12  }
   0x5   : > { %s21_s18 = ssub.s32 %s3899_s15, %s3984_s17  ;;  %s24_s19 = sadd.s32 1, %s3895_s14 }
   0x6   : > { %p22_p0 = scmp.eq.s32.totalorder %s21_s18, 0  ;;  %p31_p1 = scmp.ne.s32.totalorder %s3895_s14, %s3891_s13 }
   0x7   : > { %p32_p2 = scmp.eq.s32.totalorder %s3899_s15, 0  ;;  %p37_p3 = scmp.ne.s32.totalorder %s3891_s13, %s3887_s12 }
   0x8   : > { %s3994_s20 = scalar_select %p22_p0, %s3895_s14, %s24_s19  }
   0x9   : > { %p3996_p4 = por %p32_p2, %p31_p1  ;;  %p4711_p5 = scmp.eq.s32.totalorder %s3981_s16, 0 }
   0xa   : > { %p103_p6 = scmp.eq.s32.totalorder %s3981_s16, 1  ;;  %p2722_p7 = scmp.ge.s32.totalorder %s3899_s15, 1 }
   0xb   : > { %p4005_p8 = por %p4711_p5, %p37_p3  ;;  %p116_p9 = scmp.lt.s32.totalorder %s3899_s15, 3 }
   0xc   : > { %p4010_p10 = por %p103_p6, %p31_p1  ;;  %s3933_s25 = smov [#allocation4]  }
   0xd   : > { %s4714_s22 = scalar_select %p4005_p8, 1, 0 }
   0xe   : > { %s4715_s23 = scalar_select %p4010_p10, 1, 0 }
   0xf   : > { %p4014_p11 = pnand %p2722_p7, %p116_p9  ;;  %s128_s26 = sshll.u32 %s3933_s25, 4  ;;  %s129_s26 = int_to_ptr.vmem [resolvable:$true] %s128_s26 }
  0x10   : > { %s3934_s28 = smov [#allocation6]   ;;  %s3762_s30 = scalar_lea.vmem %s129_s26, 8192 }
  0x11   : > { %p3631_p12 = pneg %p4014_p11  ;;  %s141_s29 = sshll.u32 %s3934_s28, 4  ;;  %s142_s29 = int_to_ptr.vmem [resolvable:$true] %s141_s29 }
  0x12   : > { %p3763_p1 = scmp.ne.s32.totalorder %s129_s26, %s3762_s30  ;;  %p3770_p6 = scmp.lt.s32.totalorder %s129_s26, %s129_s26 }
  0x13   : > { %p4022_p13 = pnand %p3631_p12, %p4711_p5  ;;  %p3771_p7 = scmp.lt.s32.totalorder %s3762_s30, %s3762_s30 }
  0x15   : > { %p3753_p0 = pneg %p4022_p13  ;;  %p3772_p9 = por %p3771_p7, %p3770_p6 }
  0x17   : > { %p3765_p2 = pnand %p3763_p1, %p3753_p0 }
  0x19   : > { %p3766_p3 = pneg %p3765_p2 }
  0x1b   : > { %p3773_p12 = pnand %p3772_p9, %p3766_p3 }
  0x1d   : > { %3776 = shalt.err (!%p3773_p12)
}
  0x1e   : > { %s3935_s4 = smov 128   ;;  %s3936_s5 = smov 8  }
  0x1f   : > { %3634 = dma.hbm_to_vmem [thread:$0]  (!%p4022_p13), %s4708_s1, 8192, %s129_s26, [#allocation5], %s3935_s4, %s3935_s4, %s3936_s5  }
  0x20   : > { %s3788_s8 = scalar_lea.vmem %s142_s29, 64  ;;  %p3796_p10 = scmp.lt.s32.totalorder %s142_s29, %s142_s29 }
  0x21   : > { %p3789_p5 = scmp.ne.s32.totalorder %s142_s29, %s3788_s8  ;;  %p3797_p8 = scmp.lt.s32.totalorder %s3788_s8, %s3788_s8 }
  0x23   : > { %p3791_p1 = pnand %p3789_p5, %p3753_p0  ;;  %p3798_p6 = por %p3797_p8, %p3796_p10 }
  0x25   : > { %p3792_p2 = pneg %p3791_p1 }
  0x27   : > { %p3799_p3 = pnand %p3798_p6, %p3792_p2 }
  0x29   : > { %3802 = shalt.err (!%p3799_p3)
}
  0x2a   : > { %s3937_s9 = smov 16   ;;  %s3938_s10 = smov 1  }
  0x2b   : > { %3637 = dma.hbm_to_vmem [thread:$0]  (!%p4022_p13), %s4709_s2, 64, %s142_s29, [#allocation5], %s3937_s9, %s3937_s9, %s3938_s10  }
  0x2c   : > { %p2725_p7 = scmp.ge.s32.totalorder %s3899_s15, 2 }
  0x2e   : > { %151 = sbr.rel (%p2725_p7) target bundleno = 85 (0x55), region = 24 }
  0x33   : > { %154 = sbr.rel (!%p3996_p4) target bundleno = 85 (0x55), region = 28  ;;  %s155_s18 = sand.u32 (%p3996_p4), 1, %s3895_s14  }
  0x34   : > { %s160_s19 = smul.u32 (%p3996_p4), 48, %s3899_s15  ;;  %s4052_s30 = scalar_lea.sflag (%p3996_p4), [#allocation3], %s155_s18 }
  0x35   : > { %s3620_s25 = smul.u32 (%p3996_p4), 384, %s155_s18 }
  0x36   : > { %s161_s26 = ssub.s32 (%p3996_p4), 75, %s160_s19 }
  0x37   : > { %p162_p5 = scmp.lt.s32.totalorder (%p3996_p4), %s161_s26, 48  ;;  %s159_s29 = scalar_lea.vmem (%p3996_p4), [#allocation2], %s3620_s25 }
  0x39   : > { %s4732_s26 = smov (!%p162_p5, %s161_s26), 48 }
  0x3a   : > { %s4049_s28 = sshll.u32 %s4732_s26, 7 }
  0x3b   : > { %s166_s27 = ssub.s32 6144, %s4049_s28 }
  0x3c   : > { %167 = vsyncadd %s4052_s30, %s166_s27  ;;  %p2727_p4 = scmp.ne.s32.totalorder %s4049_s28, 0  ;;  %s2754_s21 = smul.u32 6144, %s3899_s15 }
  0x3d   : > { %s172_s4 = sshll.u32 %s159_s29, 4  ;;  %s3807_s15 = scalar_lea.hbm %s4707_s0, 9600  ;;  %s4062_s4 = int_to_ptr.vmem [resolvable:$true] %s172_s4 }
  0x3e   : > { %s4060_s7 = scalar_lea.hbm %s4707_s0, %s2754_s21 }
  0x3f   : > { %s3803_s8 = scalar_lea.hbm %s4060_s7, %s4049_s28  ;;  %p3808_p0 = scmp.lt.s32.totalorder %s4060_s7, %s4707_s0 }
  0x40   : > { %p3804_p8 = scmp.ne.s32.totalorder %s4060_s7, %s3803_s8  ;;  %p3809_p9 = scmp.lt.s32.totalorder %s3807_s15, %s3803_s8 }
  0x42   : > { %p3805_p10 = pnand %p3804_p8, %p2727_p4  ;;  %p3810_p12 = por %p3809_p9, %p3808_p0 }
  0x44   : > { %p3806_p13 = pneg %p3805_p10 }
  0x46   : > { %p3811_p1 = pnand %p3810_p12, %p3806_p13 }
  0x48   : > { %3814 = shalt.err (!%p3811_p1)
}
  0x49   : > { %s3815_s18 = scalar_lea.vmem %s4062_s4, %s4049_s28  ;;  %s3939_s19 = smov [#allocation2]  }
  0x4a   : > { %p3816_p2 = scmp.ne.s32.totalorder %s4062_s4, %s3815_s18  ;;  %s3819_s25 = sshll.u32 %s3939_s19, 4  ;;  %s3820_s25 = int_to_ptr.vmem [resolvable:$false] %s3819_s25 }
  0x4b   : > { %s3821_s26 = scalar_lea.vmem %s3820_s25, 12288  ;;  %p3822_p7 = scmp.lt.s32.totalorder %s4062_s4, %s3820_s25 }
  0x4c   : > { %p3817_p6 = pnand %p3816_p2, %p2727_p4  ;;  %p3823_p5 = scmp.lt.s32.totalorder %s3821_s26, %s3815_s18 }
  0x4e   : > { %p3818_p3 = pneg %p3817_p6  ;;  %p3824_p8 = por %p3823_p5, %p3822_p7 }
  0x50   : > { %p3825_p10 = pnand %p3824_p8, %p3818_p3 }
  0x52   : > { %3828 = shalt.err (!%p3825_p10)
}
  0x53   : > { %s3940_s27 = smov 128   ;;  %s3941_s29 = smov 8  }
  0x54   : > { %178 = dma.hbm_to_vmem [thread:$0]  (%p2727_p4), %s4060_s7, %s4049_s28, %s4062_s4, %s4052_s30, %s3940_s27, %s3940_s27, %s3941_s29  }
  0x55 PF: > { %184 = sbr.rel (%p4014_p11) target bundleno = 1497 (0x5d9), region = 32  ;;  %s186_s21 = sand.u32 (!%p4014_p11), 1, %s3891_s13  }
  0x56   : > { %s4091_s5 = smul.u32 (!%p4014_p11), 384, %s186_s21  ;;  %s187_s6 = scalar_lea.sflag (!%p4014_p11), [#allocation3], %s186_s21 }
  0x57   : > { %p4718_p13 = scmp.ne.s32.totalorder (!%p4014_p11), %s4714_s22, 0 }
  0x58   : > { %s4094_s8 = scalar_lea.vmem (!%p4014_p11), [#allocation2], %s4091_s5 }
  0x5a   : > { %3878 = dma.done.wait (%p4718_p13), %s187_s6, 6144  }
  0x5b   : > { %3880 = vsyncadd (%p4718_p13), %s187_s6, 4294961152  ;;  %p4719_p4 = scmp.eq.s32.totalorder %s3981_s16, 0 }
  0x5d   : > { %3882 = dma.done.wait (%p4719_p4), [#allocation5], 8256   ;;  %p4720_p0 = pmov %p4719_p4 }
  0x5e   : > { %v4104_v0 = vld [vmem:[#allocation4 + $0x78] sm:$0xff]  ;;  %v4106_v1 = vld [vmem:[#allocation4 + $0x70] sm:$0xff]  ;;  %v4110_v2 = vld [vmem:[#allocation4 + $0x68] sm:$0xff]  ;;  %vm1452_vm0 = vcmask 15360   ;;  %s4354_s22 = scalar_lea.vmem [#allocation7], %s4091_s5   ;;  %p4721_p11 = scmp.ne.s32.totalorder %s4715_s23, 0 }
  0x5f   : > { %3884 = vsyncadd (%p4720_p0), [#allocation5], 4294959040  ;;  %3076 = vmatprep.subr.mxu0 %v4104_v0  ;;  %v4114_v3 = vld [vmem:[#allocation4 + $0x60] sm:$0xff]  ;;  %v4119_v5 = vld [vmem:[#allocation4 + $0x58] sm:$0xff]  ;;  %s2292_s24 = smul.u32 (%p4721_p11), 48, %s3981_s16 }
  0x60   : > { %3077 = vmatpush3.msra.mxu0 %v4104_v0  ;;  %v230_v4 = vld [vmem:[%s4094_s8] sm:$0xff]  ;;  %v4123_v6 = vld [vmem:[#allocation4 + $0x50] sm:$0xff]  ;;  %v4127_v7 = vld [vmem:[#allocation4 + $0x48] sm:$0xff]  ;;  %s2755_s28 = smul.u32 (%p4721_p11), 384, %s3981_s16 }
  0x61   : > { %3078 = vmatprep.subr.mxu0 %v4106_v1  ;;  %3108 = vmatprep.mubr.f32.mxu0 %v230_v4  ;;  %v4131_v8 = vld [vmem:[#allocation4 + $0x40] sm:$0xff]  ;;  %v4135_v9 = vld [vmem:[#allocation4 + $0x38] sm:$0xff]  ;;  %v4139_v10 = vld [vmem:[#allocation4 + $0x30] sm:$0xff]  ;;  %s2293_s30 = ssub.s32 (%p4721_p11), 75, %s2292_s24 }
  0x62   : > { %3079 = vmatpush3.msra.mxu0 %v4106_v1  ;;  %v590_v11 = vld [vmem:[#allocation4 + $0xf8] sm:$0xff]  ;;  %v589_v12 = vld [vmem:[#allocation4 + $0xf0] sm:$0xff]  ;;  %v4143_v13 = vld [vmem:[#allocation4 + $0x28] sm:$0xff]  ;;  %p2294_p9 = scmp.lt.s32.totalorder (%p4721_p11), %s2293_s30, 48  ;;  %s4542_s9 = scalar_lea.vmem (%p4721_p11), %s4710_s3, %s2755_s28  }
  0x63   : > { %3080 = vmatprep.subr.mxu0 %v4110_v2  ;;  %3156 = vmatprep.subr.mxu1 %v590_v11  ;;  %v588_v14 = vld [vmem:[#allocation4 + $0xe8] sm:$0xff]  ;;  %v4147_v15 = vld [vmem:[#allocation4 + $0x20] sm:$0xff]  ;;  %v4151_v17 = vld [vmem:[#allocation4 + $0x18] sm:$0xff] }
  0x64   : > { %3081 = vmatpush3.msra.mxu0 %v4110_v2  ;;  %3157 = vmatpush3.msra.mxu1 %v590_v11  ;;  %v587_v16 = vld [vmem:[#allocation4 + $0xe0] sm:$0xff]  ;;  %v586_v18 = vld [vmem:[#allocation4 + $0xd8] sm:$0xff]  ;;  %v264_v19 = vld [vmem:[#allocation4 + $0x10] sm:$0xff] }
  0x65   : > { %3082 = vmatprep.subr.mxu0 %v4114_v3  ;;  %3158 = vmatprep.subr.mxu1 %v589_v12  ;;  %v585_v20 = vld [vmem:[#allocation4 + $0xd0] sm:$0xff]  ;;  %v263_v21 = vld [vmem:[#allocation4 + $0x8] sm:$0xff]  ;;  %v262_v23 = vld [vmem:[#allocation4] sm:$0xff] }
  0x66   : > { %3083 = vmatpush3.msra.mxu0 %v4114_v3  ;;  %3159 = vmatpush3.msra.mxu1 %v589_v12  ;;  %v584_v22 = vld [vmem:[#allocation4 + $0xc8] sm:$0xff]  ;;  %v583_v24 = vld [vmem:[#allocation4 + $0xc0] sm:$0xff]  ;;  %v582_v26 = vld [vmem:[#allocation4 + $0xb8] sm:$0xff] }
  0x67   : > { %3084 = vmatprep.subr.mxu0 %v4119_v5  ;;  %3160 = vmatprep.subr.mxu1 %v588_v14  ;;  %v231_v25 = vld [vmem:[%s4094_s8 + $0x8] sm:$0xff]  ;;  %v232_v27 = vld [vmem:[%s4094_s8 + $0x10] sm:$0xff]  ;;  %v233_v29 = vld [vmem:[%s4094_s8 + $0x18] sm:$0xff] }
  0x68   : > { %3085 = vmatpush3.msra.mxu0 %v4119_v5  ;;  %3161 = vmatpush3.msra.mxu1 %v588_v14  ;;  %v581_v28 = vld [vmem:[#allocation4 + $0xb0] sm:$0xff]  ;;  %v580_v30 = vld [vmem:[#allocation4 + $0xa8] sm:$0xff]  ;;  %v234_v31 = vld [vmem:[%s4094_s8 + $0x20] sm:$0xff] }
  0x69   : > { %3086 = vmatprep.subr.mxu0 %v4123_v6  ;;  %3162 = vmatprep.subr.mxu1 %v587_v16  ;;  %v235_v32 = vld [vmem:[%s4094_s8 + $0x28] sm:$0xff]  ;;  %v236_v33 = vld [vmem:[%s4094_s8 + $0x30] sm:$0xff]  ;;  %v237_v34 = vld [vmem:[%s4094_s8 + $0x38] sm:$0xff] }
  0x6a   : > { %3087 = vmatpush3.msra.mxu0 %v4123_v6  ;;  %3163 = vmatpush3.msra.mxu1 %v587_v16  ;;  %v238_v35 = vld [vmem:[%s4094_s8 + $0x40] sm:$0xff]  ;;  %v239_v36 = vld [vmem:[%s4094_s8 + $0x48] sm:$0xff]  ;;  %v240_v37 = vld [vmem:[%s4094_s8 + $0x50] sm:$0xff] }
  0x6b   : > { %3088 = vmatprep.subr.mxu0 %v4127_v7  ;;  %3164 = vmatprep.subr.mxu1 %v586_v18  ;;  %v241_v38 = vld [vmem:[%s4094_s8 + $0x58] sm:$0xff]  ;;  %v242_v39 = vld [vmem:[%s4094_s8 + $0x60] sm:$0xff]  ;;  %v243_v40 = vld [vmem:[%s4094_s8 + $0x68] sm:$0xff] }
  0x6c   : > { %3089 = vmatpush3.msra.mxu0 %v4127_v7  ;;  %3165 = vmatpush3.msra.mxu1 %v586_v18  ;;  %v244_v41 = vld [vmem:[%s4094_s8 + $0x70] sm:$0xff]  ;;  %v245_v42 = vld [vmem:[%s4094_s8 + $0x78] sm:$0xff]  ;;  %v246_v43 = vld [vmem:[%s4094_s8 + $0x80] sm:$0xff] }
  0x6d   : > { %3090 = vmatprep.subr.mxu0 %v4131_v8  ;;  %3166 = vmatprep.subr.mxu1 %v585_v20  ;;  %v247_v44 = vld [vmem:[%s4094_s8 + $0x88] sm:$0xff]  ;;  %v248_v45 = vld [vmem:[%s4094_s8 + $0x90] sm:$0xff]  ;;  %v249_v46 = vld [vmem:[%s4094_s8 + $0x98] sm:$0xff] }
  0x6e   : > { %3091 = vmatpush3.msra.mxu0 %v4131_v8  ;;  %3167 = vmatpush3.msra.mxu1 %v585_v20  ;;  %v250_v47 = vld [vmem:[%s4094_s8 + $0xa0] sm:$0xff]  ;;  %v251_v48 = vld [vmem:[%s4094_s8 + $0xa8] sm:$0xff]  ;;  %v252_v49 = vld [vmem:[%s4094_s8 + $0xb0] sm:$0xff] }
  0x6f   : > { %3092 = vmatprep.subr.mxu0 %v4135_v9  ;;  %3168 = vmatprep.subr.mxu1 %v584_v22  ;;  %v253_v50 = vld [vmem:[%s4094_s8 + $0xb8] sm:$0xff]  ;;  %v254_v51 = vld [vmem:[%s4094_s8 + $0xc0] sm:$0xff]  ;;  %v255_v52 = vld [vmem:[%s4094_s8 + $0xc8] sm:$0xff] }
  0x70   : > { %3093 = vmatpush3.msra.mxu0 %v4135_v9  ;;  %3169 = vmatpush3.msra.mxu1 %v584_v22  ;;  %v256_v53 = vld [vmem:[%s4094_s8 + $0xd0] sm:$0xff]  ;;  %v257_v54 = vld [vmem:[%s4094_s8 + $0xd8] sm:$0xff]  ;;  %v258_v55 = vld [vmem:[%s4094_s8 + $0xe0] sm:$0xff] }
  0x71   : > { %3094 = vmatprep.subr.mxu0 %v4139_v10  ;;  %3170 = vmatprep.subr.mxu1 %v583_v24  ;;  %v259_v56 = vld [vmem:[%s4094_s8 + $0xe8] sm:$0xff]  ;;  %v260_v57 = vld [vmem:[%s4094_s8 + $0xf0] sm:$0xff]  ;;  %v261_v58 = vld [vmem:[%s4094_s8 + $0xf8] sm:$0xff] }
  0x72   : > { %3095 = vmatpush3.msra.mxu0 %v4139_v10  ;;  %3171 = vmatpush3.msra.mxu1 %v583_v24  ;;  %v579_v59 = vld [vmem:[#allocation4 + $0xa0] sm:$0xff]  ;;  %v578_v60 = vld [vmem:[#allocation4 + $0x98] sm:$0xff]  ;;  %v577_v61 = vld [vmem:[#allocation4 + $0x90] sm:$0xff] }
  0x73   : > { %3096 = vmatprep.subr.mxu0 %v4143_v13  ;;  %3172 = vmatprep.subr.mxu1 %v582_v26  ;;  %v576_v62 = vld [vmem:[#allocation4 + $0x88] sm:$0xff]  ;;  %v575_v63 = vld [vmem:[#allocation4 + $0x80] sm:$0xff]  ;;  %v904_v4 = vld [vmem:[#allocation4 + $0x178] sm:$0xff] }
  0x74   : > { %3097 = vmatpush3.msra.mxu0 %v4143_v13  ;;  %3173 = vmatpush3.msra.mxu1 %v582_v26  ;;  %v903_v11 = vld [vmem:[#allocation4 + $0x170] sm:$0xff]  ;;  %v902_v12 = vld [vmem:[#allocation4 + $0x168] sm:$0xff]  ;;  %v901_v14 = vld [vmem:[#allocation4 + $0x160] sm:$0xff] }
  0x75   : > { %3098 = vmatprep.subr.mxu0 %v4147_v15  ;;  %3174 = vmatprep.subr.mxu1 %v581_v28  ;;  %v900_v16 = vld [vmem:[#allocation4 + $0x158] sm:$0xff]  ;;  %v899_v18 = vld [vmem:[#allocation4 + $0x150] sm:$0xff]  ;;  %v897_v20 = vld [vmem:[#allocation4 + $0x140] sm:$0xff] }
  0x76   : > { %3099 = vmatpush3.msra.mxu0 %v4147_v15  ;;  %3175 = vmatpush3.msra.mxu1 %v581_v28  ;;  %v895_v22 = vld [vmem:[#allocation4 + $0x130] sm:$0xff]  ;;  %v893_v24 = vld [vmem:[#allocation4 + $0x120] sm:$0xff] }
  0x77   : > { %3100 = vmatprep.subr.mxu0 %v4151_v17  ;;  %3176 = vmatprep.subr.mxu1 %v580_v30  ;;  %v891_v26 = vld [vmem:[#allocation4 + $0x110] sm:$0xff] }
  0x78   : > { %3101 = vmatpush3.msra.mxu0 %v4151_v17  ;;  %3177 = vmatpush3.msra.mxu1 %v580_v30 }
  0x79   : > { %3102 = vmatprep.subr.mxu0 %v264_v19  ;;  %3178 = vmatprep.subr.mxu1 %v579_v59 }
  0x7a   : > { %3103 = vmatpush3.msra.mxu0 %v264_v19  ;;  %3179 = vmatpush3.msra.mxu1 %v579_v59  ;;  %v898_v19 = vld [vmem:[#allocation4 + $0x148] sm:$0xff] }
  0x7b   : > { %3104 = vmatprep.subr.mxu0 %v263_v21  ;;  %3180 = vmatprep.subr.mxu1 %v578_v60 }
  0x7c   : > { %3105 = vmatpush3.msra.mxu0 %v263_v21  ;;  %3181 = vmatpush3.msra.mxu1 %v578_v60  ;;  %v896_v21 = vld [vmem:[#allocation4 + $0x138] sm:$0xff] }
  0x7d   : > { %3106 = vmatprep.subr.mxu0 %v262_v23  ;;  %3182 = vmatprep.subr.mxu1 %v577_v61 }
  0x7e   : > { %3107 = vmatpush3.msra.mxu0 %v262_v23  ;;  %3183 = vmatpush3.msra.mxu1 %v577_v61  ;;  %v894_v23 = vld [vmem:[#allocation4 + $0x128] sm:$0xff] }
  0x7f   : > { %3109 = vmatmul.mubr.f32.vlgmr.msra.gmra.mxu0 %v231_v25  ;;  %3184 = vmatprep.subr.mxu1 %v576_v62  ;;  %v892_v25 = vld [vmem:[#allocation4 + $0x118] sm:$0xff] }
  0x80   : > { %3111 = vmatprep.mubr.f32.mxu0 %v232_v27  ;;  %3185 = vmatpush3.msra.mxu1 %v576_v62  ;;  %v4188_v27 = vld [vmem:[#allocation6] ss:$0 sm:$0xff] }
  0x81   : > { %3186 = vmatprep.subr.mxu1 %v575_v63  ;;  %3236 = vmatprep.subr.mxu0 %v904_v4 }
  0x82   : > { %3187 = vmatpush3.msra.mxu1 %v575_v63  ;;  %3237 = vmatpush3.msra.mxu0 %v904_v4 }
  0x83   : > { %3112 = vmatmul.mubr.f32.gmra.mxu0 %v233_v29  ;;  %3238 = vmatprep.subr.mxu0 %v903_v11 }
  0x84   : > { %3114 = vmatprep.mubr.f32.mxu0 %v234_v31  ;;  %3239 = vmatpush3.msra.mxu0 %v903_v11 }
  0x85   : > { %3240 = vmatprep.subr.mxu0 %v902_v12 }
  0x86   : > { %3241 = vmatpush3.msra.mxu0 %v902_v12 }
  0x87   : > { %3115 = vmatmul.mubr.f32.gmra.mxu0 %v235_v32  ;;  %3242 = vmatprep.subr.mxu0 %v901_v14 }
  0x88   : > { %3117 = vmatprep.mubr.f32.mxu0 %v236_v33  ;;  %3243 = vmatpush3.msra.mxu0 %v901_v14 }
  0x89   : > { %3244 = vmatprep.subr.mxu0 %v900_v16 }
  0x8a   : > { %3245 = vmatpush3.msra.mxu0 %v900_v16 }
  0x8b   : > { %3118 = vmatmul.mubr.f32.gmra.mxu0 %v237_v34  ;;  %3246 = vmatprep.subr.mxu0 %v899_v18 }
  0x8c   : > { %3120 = vmatprep.mubr.f32.mxu0 %v238_v35  ;;  %3247 = vmatpush3.msra.mxu0 %v899_v18 }
  0x8d   : > { %3248 = vmatprep.subr.mxu0 %v898_v19 }
  0x8e   : > { %3249 = vmatpush3.msra.mxu0 %v898_v19 }
  0x8f   : > { %3121 = vmatmul.mubr.f32.gmra.mxu0 %v239_v36  ;;  %3250 = vmatprep.subr.mxu0 %v897_v20 }
  0x90   : > { %3123 = vmatprep.mubr.f32.mxu0 %v240_v37  ;;  %3251 = vmatpush3.msra.mxu0 %v897_v20 }
  0x91   : > { %3252 = vmatprep.subr.mxu0 %v896_v21 }
  0x92   : > { %3253 = vmatpush3.msra.mxu0 %v896_v21 }
  0x93   : > { %3124 = vmatmul.mubr.f32.gmra.mxu0 %v241_v38  ;;  %3254 = vmatprep.subr.mxu0 %v895_v22 }
  0x94   : > { %3126 = vmatprep.mubr.f32.mxu0 %v242_v39  ;;  %3255 = vmatpush3.msra.mxu0 %v895_v22 }
  0x95   : > { %3256 = vmatprep.subr.mxu0 %v894_v23 }
  0x96   : > { %3257 = vmatpush3.msra.mxu0 %v894_v23 }
  0x97   : > { %3127 = vmatmul.mubr.f32.gmra.mxu0 %v243_v40  ;;  %3258 = vmatprep.subr.mxu0 %v893_v24 }
  0x98   : > { %3129 = vmatprep.mubr.f32.mxu0 %v244_v41  ;;  %3259 = vmatpush3.msra.mxu0 %v893_v24 }
  0x99   : > { %3260 = vmatprep.subr.mxu0 %v892_v25 }
  0x9a   : > { %3261 = vmatpush3.msra.mxu0 %v892_v25 }
  0x9b   : > { %3130 = vmatmul.mubr.f32.gmra.mxu0 %v245_v42  ;;  %3262 = vmatprep.subr.mxu0 %v891_v26 }
  0x9c   : > { %3132 = vmatprep.mubr.f32.mxu0 %v246_v43  ;;  %3263 = vmatpush3.msra.mxu0 %v891_v26 }
  0x9f   : > { %3133 = vmatmul.mubr.f32.gmra.mxu0 %v247_v44 }
  0xa0   : > { %3135 = vmatprep.mubr.f32.mxu0 %v248_v45 }
  0xa3   : > { %3136 = vmatmul.mubr.f32.gmra.mxu0 %v249_v46 }
  0xa4   : > { %3138 = vmatprep.mubr.f32.mxu0 %v250_v47 }
  0xa7   : > { %3139 = vmatmul.mubr.f32.gmra.mxu0 %v251_v48 }
  0xa8   : > { %3141 = vmatprep.mubr.f32.mxu0 %v252_v49 }
  0xab   : > { %3142 = vmatmul.mubr.f32.gmra.mxu0 %v253_v50 }
  0xac   : > { %3144 = vmatprep.mubr.f32.mxu0 %v254_v51 }
  0xaf   : > { %3145 = vmatmul.mubr.f32.gmra.mxu0 %v255_v52 }
  0xb0   : > { %3147 = vmatprep.mubr.f32.mxu0 %v256_v53 }
  0xb3   : > { %3148 = vmatmul.mubr.f32.gmra.mxu0 %v257_v54 }
  0xb4   : > { %3150 = vmatprep.mubr.f32.mxu0 %v258_v55 }
  0xb7   : > { %3151 = vmatmul.mubr.f32.gmra.mxu0 %v259_v56 }
  0xb8   : > { %3153 = vmatprep.mubr.f32.mxu0 %v260_v57 }
  0xbb   : > { %3154 = vmatmul.mubr.f32.gmra.mxu0 %v261_v58 }
 0x13f   : > { %v3110_v28 = vpop.f32.mrf.mxu0 }
 0x140   : > { %v357_v29 = vadd.f32 %v3110_v28, %v4188_v27 }
 0x141   : > { %v351_v30 = vpop.f32.mrf.mxu0 }
 0x142   : > { %v352_v31 = vadd.f32 %v4188_v27, %v351_v30  ;;  %v511_v32 = vmul.f32 0.01, %v357_v29 }
 0x143   : > { %v3113_v33 = vpop.f32.mrf.mxu0 }
 0x144   : > { %v367_v34 = vadd.f32 %v3113_v33, %v4188_v27  ;;  %v510_v35 = vmul.f32 0.01, %v352_v31  ;;  %v543_v39 = vmax.f32 %v357_v29, %v511_v32 }
 0x145   : > { %v361_v36 = vpop.f32.mrf.mxu0 }
 0x146   : > { %v362_v37 = vadd.f32 %v4188_v27, %v361_v36  ;;  %v542_v38 = vmax.f32 %v352_v31, %v510_v35  ;;  %v513_v40 = vmul.f32 0.01, %v367_v34 }
 0x147   : > { %v3116_v41 = vpop.f32.mrf.mxu0 }
 0x148   : > { %v512_v42 = vmul.f32 0.01, %v362_v37  ;;  %v377_v43 = vadd.f32 %v3116_v41, %v4188_v27  ;;  %3188 = vmatprep.mubr.f32.mxu1 %v542_v38  ;;  %v545_v47 = vmax.f32 %v367_v34, %v513_v40 }
 0x149   : > { %v371_v44 = vpop.f32.mrf.mxu0  ;;  %3189 = vmatmul.mubr.f32.vlgmr.msra.gmra.mxu1 %v543_v39 }
 0x14a   : > { %v544_v45 = vmax.f32 %v362_v37, %v512_v42  ;;  %v372_v46 = vadd.f32 %v4188_v27, %v371_v44  ;;  %v515_v48 = vmul.f32 0.01, %v377_v43 }
 0x14b   : > { %v3119_v49 = vpop.f32.mrf.mxu0 }
 0x14c   : > { %v514_v50 = vmul.f32 0.01, %v372_v46  ;;  %v387_v51 = vadd.f32 %v3119_v49, %v4188_v27  ;;  %3191 = vmatprep.mubr.f32.mxu1 %v544_v45  ;;  %v547_v55 = vmax.f32 %v377_v43, %v515_v48 }
 0x14d   : > { %v381_v52 = vpop.f32.mrf.mxu0  ;;  %3192 = vmatmul.mubr.f32.gmra.mxu1 %v545_v47 }
 0x14e   : > { %v546_v53 = vmax.f32 %v372_v46, %v514_v50  ;;  %v382_v54 = vadd.f32 %v4188_v27, %v381_v52  ;;  %v517_v56 = vmul.f32 0.01, %v387_v51 }
 0x14f   : > { %v3122_v57 = vpop.f32.mrf.mxu0 }
 0x150   : > { %v516_v58 = vmul.f32 0.01, %v382_v54  ;;  %v397_v59 = vadd.f32 %v3122_v57, %v4188_v27  ;;  %3194 = vmatprep.mubr.f32.mxu1 %v546_v53  ;;  %v549_v63 = vmax.f32 %v387_v51, %v517_v56 }
 0x151   : > { %v391_v60 = vpop.f32.mrf.mxu0  ;;  %3195 = vmatmul.mubr.f32.gmra.mxu1 %v547_v55 }
 0x152   : > { %v548_v61 = vmax.f32 %v382_v54, %v516_v58  ;;  %v392_v62 = vadd.f32 %v4188_v27, %v391_v60  ;;  %v519_v4 = vmul.f32 0.01, %v397_v59 }
 0x153   : > { %v3125_v11 = vpop.f32.mrf.mxu0 }
 0x154   : > { %v518_v12 = vmul.f32 0.01, %v392_v62  ;;  %v407_v14 = vadd.f32 %v3125_v11, %v4188_v27  ;;  %3197 = vmatprep.mubr.f32.mxu1 %v548_v61  ;;  %v551_v20 = vmax.f32 %v397_v59, %v519_v4 }
 0x155   : > { %v401_v16 = vpop.f32.mrf.mxu0  ;;  %3198 = vmatmul.mubr.f32.gmra.mxu1 %v549_v63 }
 0x156   : > { %v550_v18 = vmax.f32 %v392_v62, %v518_v12  ;;  %v402_v19 = vadd.f32 %v4188_v27, %v401_v16  ;;  %v521_v21 = vmul.f32 0.01, %v407_v14 }
 0x157   : > { %v3128_v22 = vpop.f32.mrf.mxu0 }
 0x158   : > { %v520_v23 = vmul.f32 0.01, %v402_v19  ;;  %v417_v24 = vadd.f32 %v3128_v22, %v4188_v27  ;;  %3200 = vmatprep.mubr.f32.mxu1 %v550_v18  ;;  %v553_v29 = vmax.f32 %v407_v14, %v521_v21 }
 0x159   : > { %v411_v25 = vpop.f32.mrf.mxu0  ;;  %3201 = vmatmul.mubr.f32.gmra.mxu1 %v551_v20 }
 0x15a   : > { %v552_v26 = vmax.f32 %v402_v19, %v520_v23  ;;  %v412_v28 = vadd.f32 %v4188_v27, %v411_v25  ;;  %v523_v30 = vmul.f32 0.01, %v417_v24 }
 0x15b   : > { %v3131_v31 = vpop.f32.mrf.mxu0 }
 0x15c   : > { %v522_v32 = vmul.f32 0.01, %v412_v28  ;;  %v427_v33 = vadd.f32 %v3131_v31, %v4188_v27  ;;  %3203 = vmatprep.mubr.f32.mxu1 %v552_v26  ;;  %v555_v37 = vmax.f32 %v417_v24, %v523_v30 }
 0x15d   : > { %v421_v34 = vpop.f32.mrf.mxu0  ;;  %3204 = vmatmul.mubr.f32.gmra.mxu1 %v553_v29 }
 0x15e   : > { %v554_v35 = vmax.f32 %v412_v28, %v522_v32  ;;  %v422_v36 = vadd.f32 %v4188_v27, %v421_v34  ;;  %v525_v38 = vmul.f32 0.01, %v427_v33 }
 0x15f   : > { %v3134_v39 = vpop.f32.mrf.mxu0 }
 0x160   : > { %v524_v40 = vmul.f32 0.01, %v422_v36  ;;  %v437_v41 = vadd.f32 %v3134_v39, %v4188_v27  ;;  %3206 = vmatprep.mubr.f32.mxu1 %v554_v35  ;;  %v557_v45 = vmax.f32 %v427_v33, %v525_v38 }
 0x161   : > { %v431_v42 = vpop.f32.mrf.mxu0  ;;  %3207 = vmatmul.mubr.f32.gmra.mxu1 %v555_v37 }
 0x162   : > { %v556_v43 = vmax.f32 %v422_v36, %v524_v40  ;;  %v432_v44 = vadd.f32 %v4188_v27, %v431_v42  ;;  %v527_v46 = vmul.f32 0.01, %v437_v41 }
 0x163   : > { %v3137_v47 = vpop.f32.mrf.mxu0 }
 0x164   : > { %v526_v48 = vmul.f32 0.01, %v432_v44  ;;  %v447_v49 = vadd.f32 %v3137_v47, %v4188_v27  ;;  %3209 = vmatprep.mubr.f32.mxu1 %v556_v43  ;;  %v559_v53 = vmax.f32 %v437_v41, %v527_v46 }
 0x165   : > { %v441_v50 = vpop.f32.mrf.mxu0  ;;  %3210 = vmatmul.mubr.f32.gmra.mxu1 %v557_v45 }
 0x166   : > { %v558_v51 = vmax.f32 %v432_v44, %v526_v48  ;;  %v442_v52 = vadd.f32 %v4188_v27, %v441_v50  ;;  %v529_v54 = vmul.f32 0.01, %v447_v49 }
 0x167   : > { %v3140_v55 = vpop.f32.mrf.mxu0 }
 0x168   : > { %v528_v56 = vmul.f32 0.01, %v442_v52  ;;  %v457_v57 = vadd.f32 %v3140_v55, %v4188_v27  ;;  %3212 = vmatprep.mubr.f32.mxu1 %v558_v51  ;;  %v561_v61 = vmax.f32 %v447_v49, %v529_v54 }
 0x169   : > { %v451_v58 = vpop.f32.mrf.mxu0  ;;  %3213 = vmatmul.mubr.f32.gmra.mxu1 %v559_v53 }
 0x16a   : > { %v560_v59 = vmax.f32 %v442_v52, %v528_v56  ;;  %v452_v60 = vadd.f32 %v4188_v27, %v451_v58  ;;  %v531_v62 = vmul.f32 0.01, %v457_v57  ;;  %v890_v56 = vld [vmem:[#allocation4 + $0x108] sm:$0xff]  ;;  %v1218_v58 = vld [vmem:[#allocation4 + $0x1f8] sm:$0xff] }
 0x16b   : > { %v3143_v63 = vpop.f32.mrf.mxu0  ;;  %3264 = vmatprep.subr.mxu0 %v890_v56  ;;  %3316 = vmatprep.subr.mxu1 %v1218_v58 }
 0x16c   : > { %v530_v4 = vmul.f32 0.01, %v452_v60  ;;  %v467_v11 = vadd.f32 %v3143_v63, %v4188_v27  ;;  %3215 = vmatprep.mubr.f32.mxu1 %v560_v59  ;;  %v563_v18 = vmax.f32 %v457_v57, %v531_v62  ;;  %3265 = vmatpush3.msra.mxu0 %v890_v56  ;;  %v889_v57 = vld [vmem:[#allocation4 + $0x100] sm:$0xff]  ;;  %v1217_v59 = vld [vmem:[#allocation4 + $0x1f0] sm:$0xff]  ;;  %v1212_v63 = vld [vmem:[#allocation4 + $0x1c8] sm:$0xff] }
 0x16d   : > { %v461_v12 = vpop.f32.mrf.mxu0  ;;  %3216 = vmatmul.mubr.f32.gmra.mxu1 %v561_v61  ;;  %3266 = vmatprep.subr.mxu0 %v889_v57  ;;  %v1214_v61 = vld [vmem:[#allocation4 + $0x1d8] sm:$0xff]  ;;  %v1213_v62 = vld [vmem:[#allocation4 + $0x1d0] sm:$0xff] }
 0x16e   : > { %v562_v14 = vmax.f32 %v452_v60, %v530_v4  ;;  %v462_v16 = vadd.f32 %v4188_v27, %v461_v12  ;;  %v533_v19 = vmul.f32 0.01, %v467_v11  ;;  %3267 = vmatpush3.msra.mxu0 %v889_v57  ;;  %3317 = vmatpush3.msra.mxu1 %v1218_v58  ;;  %v1215_v60 = vld [vmem:[#allocation4 + $0x1e0] sm:$0xff]  ;;  %v1209_v12 = vld [vmem:[#allocation4 + $0x1b0] sm:$0xff] }
 0x16f   : > { %v3146_v20 = vpop.f32.mrf.mxu0  ;;  %3396 = vmatprep.subr.mxu0 %v4104_v0  ;;  %3318 = vmatprep.subr.mxu1 %v1217_v59  ;;  %v1211_v4 = vld [vmem:[#allocation4 + $0x1c0] sm:$0xff] }
 0x170   : > { %v532_v21 = vmul.f32 0.01, %v462_v16  ;;  %v477_v22 = vadd.f32 %v3146_v20, %v4188_v27  ;;  %3218 = vmatprep.mubr.f32.mxu1 %v562_v14  ;;  %v565_v26 = vmax.f32 %v467_v11, %v533_v19  ;;  %3319 = vmatpush3.msra.mxu1 %v1217_v59  ;;  %v1210_v11 = vld [vmem:[#allocation4 + $0x1b8] sm:$0xff]  ;;  %v1208_v14 = vld [vmem:[#allocation4 + $0x1a8] sm:$0xff]  ;;  %v4223_v19 = vld [vmem:[#allocation6 + $0x1] ss:$0 sm:$0xff] }
 0x171   : > { %v471_v23 = vpop.f32.mrf.mxu0  ;;  %3219 = vmatmul.mubr.f32.gmra.mxu1 %v563_v18  ;;  %v1206_v18 = vld [vmem:[#allocation4 + $0x198] sm:$0xff]  ;;  %v1205_v20 = vld [vmem:[#allocation4 + $0x190] sm:$0xff] }
 0x172   : > { %v564_v24 = vmax.f32 %v462_v16, %v532_v21  ;;  %v472_v25 = vadd.f32 %v4188_v27, %v471_v23  ;;  %v535_v28 = vmul.f32 0.01, %v477_v22  ;;  %v1207_v16 = vld [vmem:[#allocation4 + $0x1a0] sm:$0xff] }
 0x173   : > { %v3149_v29 = vpop.f32.mrf.mxu0 }
 0x174   : > { %v534_v30 = vmul.f32 0.01, %v472_v25  ;;  %v487_v31 = vadd.f32 %v3149_v29, %v4188_v27  ;;  %3221 = vmatprep.mubr.f32.mxu1 %v564_v24  ;;  %v567_v35 = vmax.f32 %v477_v22, %v535_v28 }
 0x175   : > { %v481_v32 = vpop.f32.mrf.mxu0  ;;  %3222 = vmatmul.mubr.f32.gmra.mxu1 %v565_v26 }
 0x176   : > { %v566_v33 = vmax.f32 %v472_v25, %v534_v30  ;;  %v482_v34 = vadd.f32 %v4188_v27, %v481_v32  ;;  %v537_v36 = vmul.f32 0.01, %v487_v31 }
 0x177   : > { %v3152_v37 = vpop.f32.mrf.mxu0 }
 0x178   : > { %v536_v38 = vmul.f32 0.01, %v482_v34  ;;  %v497_v39 = vadd.f32 %v3152_v37, %v4188_v27  ;;  %3224 = vmatprep.mubr.f32.mxu1 %v566_v33  ;;  %v569_v43 = vmax.f32 %v487_v31, %v537_v36 }
 0x179   : > { %v491_v40 = vpop.f32.mrf.mxu0  ;;  %3225 = vmatmul.mubr.f32.gmra.mxu1 %v567_v35 }
 0x17a   : > { %v568_v41 = vmax.f32 %v482_v34, %v536_v38  ;;  %v492_v42 = vadd.f32 %v4188_v27, %v491_v40  ;;  %v539_v44 = vmul.f32 0.01, %v497_v39 }
 0x17b   : > { %v3155_v45 = vpop.f32.mrf.mxu0 }
 0x17c   : > { %v538_v46 = vmul.f32 0.01, %v492_v42  ;;  %v507_v47 = vadd.f32 %v3155_v45, %v4188_v27  ;;  %3227 = vmatprep.mubr.f32.mxu1 %v568_v41  ;;  %v571_v51 = vmax.f32 %v497_v39, %v539_v44 }
 0x17d   : > { %v501_v48 = vpop.f32.mrf.mxu0  ;;  %3228 = vmatmul.mubr.f32.gmra.mxu1 %v569_v43 }
 0x17e   : > { %v570_v49 = vmax.f32 %v492_v42, %v538_v46  ;;  %v502_v50 = vadd.f32 %v4188_v27, %v501_v48  ;;  %v541_v52 = vmul.f32 0.01, %v507_v47  ;;  %v1216_v27 = vld [vmem:[#allocation4 + $0x1e8] sm:$0xff] }
 0x17f   : > { %3320 = vmatprep.subr.mxu1 %v1216_v27 }
 0x180   : > { %v540_v53 = vmul.f32 0.01, %v502_v50  ;;  %3230 = vmatprep.mubr.f32.mxu1 %v570_v49  ;;  %v573_v55 = vmax.f32 %v507_v47, %v541_v52  ;;  %3321 = vmatpush3.msra.mxu1 %v1216_v27 }
 0x181   : > { %3231 = vmatmul.mubr.f32.gmra.mxu1 %v571_v51  ;;  %3322 = vmatprep.subr.mxu1 %v1215_v60 }
 0x182   : > { %v572_v54 = vmax.f32 %v502_v50, %v540_v53  ;;  %3323 = vmatpush3.msra.mxu1 %v1215_v60 }
 0x183   : > { %3324 = vmatprep.subr.mxu1 %v1214_v61 }
 0x184   : > { %3233 = vmatprep.mubr.f32.mxu1 %v572_v54  ;;  %3325 = vmatpush3.msra.mxu1 %v1214_v61 }
 0x185   : > { %3234 = vmatmul.mubr.f32.gmra.mxu1 %v573_v55  ;;  %3326 = vmatprep.subr.mxu1 %v1213_v62 }
 0x186   : > { %3327 = vmatpush3.msra.mxu1 %v1213_v62 }
 0x187   : > { %3328 = vmatprep.subr.mxu1 %v1212_v63 }
 0x188   : > { %3329 = vmatpush3.msra.mxu1 %v1212_v63 }
 0x189   : > { %3330 = vmatprep.subr.mxu1 %v1211_v4 }
 0x18a   : > { %3331 = vmatpush3.msra.mxu1 %v1211_v4 }
 0x18b   : > { %3332 = vmatprep.subr.mxu1 %v1210_v11 }
 0x18c   : > { %3333 = vmatpush3.msra.mxu1 %v1210_v11 }
 0x18d   : > { %3334 = vmatprep.subr.mxu1 %v1209_v12 }
 0x18e   : > { %3335 = vmatpush3.msra.mxu1 %v1209_v12 }
 0x18f   : > { %3336 = vmatprep.subr.mxu1 %v1208_v14 }
 0x190   : > { %3337 = vmatpush3.msra.mxu1 %v1208_v14 }
 0x191   : > { %3338 = vmatprep.subr.mxu1 %v1207_v16 }
 0x192   : > { %3339 = vmatpush3.msra.mxu1 %v1207_v16 }
 0x193   : > { %3340 = vmatprep.subr.mxu1 %v1206_v18 }
 0x194   : > { %3341 = vmatpush3.msra.mxu1 %v1206_v18 }
 0x195   : > { %3342 = vmatprep.subr.mxu1 %v1205_v20 }
 0x196   : > { %3343 = vmatpush3.msra.mxu1 %v1205_v20 }
 0x209   : > { %v3190_v21 = vpop.f32.mrf.mxu1 }
 0x20a   : > { %v671_v22 = vadd.f32 %v3190_v21, %v4223_v19 }
 0x20b   : > { %v665_v23 = vpop.f32.mrf.mxu1 }
 0x20c   : > { %v666_v24 = vadd.f32 %v4223_v19, %v665_v23  ;;  %v825_v25 = vmul.f32 0.01, %v671_v22 }
 0x20d   : > { %v3193_v26 = vpop.f32.mrf.mxu1 }
 0x20e   : > { %v824_v28 = vmul.f32 0.01, %v666_v24  ;;  %v681_v29 = vadd.f32 %v3193_v26, %v4223_v19  ;;  %v857_v33 = vmax.f32 %v671_v22, %v825_v25 }
 0x20f   : > { %v675_v30 = vpop.f32.mrf.mxu1 }
 0x210   : > { %v856_v31 = vmax.f32 %v666_v24, %v824_v28  ;;  %v676_v32 = vadd.f32 %v4223_v19, %v675_v30  ;;  %v827_v34 = vmul.f32 0.01, %v681_v29 }
 0x211   : > { %v3196_v35 = vpop.f32.mrf.mxu1 }
 0x212   : > { %v826_v36 = vmul.f32 0.01, %v676_v32  ;;  %v691_v37 = vadd.f32 %v3196_v35, %v4223_v19  ;;  %3268 = vmatprep.mubr.f32.mxu0 %v856_v31  ;;  %v859_v41 = vmax.f32 %v681_v29, %v827_v34 }
 0x213   : > { %v685_v38 = vpop.f32.mrf.mxu1  ;;  %3269 = vmatmul.mubr.f32.vlgmr.msra.gmra.mxu0 %v857_v33 }
 0x214   : > { %v858_v39 = vmax.f32 %v676_v32, %v826_v36  ;;  %v686_v40 = vadd.f32 %v4223_v19, %v685_v38  ;;  %3397 = vmatpush3.msra.mxu0 %v4104_v0  ;;  %v829_v42 = vmul.f32 0.01, %v691_v37 }
 0x215   : > { %v3199_v43 = vpop.f32.mrf.mxu1  ;;  %3398 = vmatprep.subr.mxu0 %v4106_v1 }
 0x216   : > { %v828_v44 = vmul.f32 0.01, %v686_v40  ;;  %v701_v45 = vadd.f32 %v3199_v43, %v4223_v19  ;;  %3271 = vmatprep.mubr.f32.mxu0 %v858_v39  ;;  %3399 = vmatpush3.msra.mxu0 %v4106_v1  ;;  %v861_v0 = vmax.f32 %v691_v37, %v829_v42 }
 0x217   : > { %v695_v46 = vpop.f32.mrf.mxu1  ;;  %3272 = vmatmul.mubr.f32.gmra.mxu0 %v859_v41  ;;  %3400 = vmatprep.subr.mxu0 %v4110_v2 }
 0x218   : > { %v860_v47 = vmax.f32 %v686_v40, %v828_v44  ;;  %v696_v48 = vadd.f32 %v4223_v19, %v695_v46  ;;  %3401 = vmatpush3.msra.mxu0 %v4110_v2  ;;  %v831_v49 = vmul.f32 0.01, %v701_v45 }
 0x219   : > { %v3202_v50 = vpop.f32.mrf.mxu1  ;;  %3402 = vmatprep.subr.mxu0 %v4114_v3 }
 0x21a   : > { %v830_v51 = vmul.f32 0.01, %v696_v48  ;;  %v711_v52 = vadd.f32 %v3202_v50, %v4223_v19  ;;  %3274 = vmatprep.mubr.f32.mxu0 %v860_v47  ;;  %3403 = vmatpush3.msra.mxu0 %v4114_v3  ;;  %v863_v2 = vmax.f32 %v701_v45, %v831_v49 }
 0x21b   : > { %v705_v1 = vpop.f32.mrf.mxu1  ;;  %3275 = vmatmul.mubr.f32.gmra.mxu0 %v861_v0  ;;  %3404 = vmatprep.subr.mxu0 %v4119_v5 }
 0x21c   : > { %v862_v53 = vmax.f32 %v696_v48, %v830_v51  ;;  %v706_v54 = vadd.f32 %v4223_v19, %v705_v1  ;;  %3405 = vmatpush3.msra.mxu0 %v4119_v5  ;;  %v833_v55 = vmul.f32 0.01, %v711_v52 }
 0x21d   : > { %v3205_v56 = vpop.f32.mrf.mxu1  ;;  %3406 = vmatprep.subr.mxu0 %v4123_v6 }
 0x21e   : > { %v832_v57 = vmul.f32 0.01, %v706_v54  ;;  %v721_v58 = vadd.f32 %v3205_v56, %v4223_v19  ;;  %3277 = vmatprep.mubr.f32.mxu0 %v862_v53  ;;  %3407 = vmatpush3.msra.mxu0 %v4123_v6  ;;  %v865_v5 = vmax.f32 %v711_v52, %v833_v55 }
 0x21f   : > { %v715_v3 = vpop.f32.mrf.mxu1  ;;  %3278 = vmatmul.mubr.f32.gmra.mxu0 %v863_v2  ;;  %3408 = vmatprep.subr.mxu0 %v4127_v7 }
 0x220   : > { %v864_v59 = vmax.f32 %v706_v54, %v832_v57  ;;  %v716_v27 = vadd.f32 %v4223_v19, %v715_v3  ;;  %3409 = vmatpush3.msra.mxu0 %v4127_v7  ;;  %v835_v60 = vmul.f32 0.01, %v721_v58 }
 0x221   : > { %v3208_v61 = vpop.f32.mrf.mxu1  ;;  %3410 = vmatprep.subr.mxu0 %v4131_v8 }
 0x222   : > { %v834_v62 = vmul.f32 0.01, %v716_v27  ;;  %v731_v63 = vadd.f32 %v3208_v61, %v4223_v19  ;;  %3280 = vmatprep.mubr.f32.mxu0 %v864_v59  ;;  %3411 = vmatpush3.msra.mxu0 %v4131_v8  ;;  %v867_v7 = vmax.f32 %v721_v58, %v835_v60 }
 0x223   : > { %v725_v6 = vpop.f32.mrf.mxu1  ;;  %3281 = vmatmul.mubr.f32.gmra.mxu0 %v865_v5  ;;  %3412 = vmatprep.subr.mxu0 %v4135_v9 }
 0x224   : > { %v866_v4 = vmax.f32 %v716_v27, %v834_v62  ;;  %v726_v11 = vadd.f32 %v4223_v19, %v725_v6  ;;  %3413 = vmatpush3.msra.mxu0 %v4135_v9  ;;  %v837_v12 = vmul.f32 0.01, %v731_v63 }
 0x225   : > { %v3211_v14 = vpop.f32.mrf.mxu1  ;;  %3414 = vmatprep.subr.mxu0 %v4139_v10 }
 0x226   : > { %v836_v16 = vmul.f32 0.01, %v726_v11  ;;  %v741_v18 = vadd.f32 %v3211_v14, %v4223_v19  ;;  %3283 = vmatprep.mubr.f32.mxu0 %v866_v4  ;;  %3415 = vmatpush3.msra.mxu0 %v4139_v10  ;;  %v869_v9 = vmax.f32 %v731_v63, %v837_v12  ;;  %v1503_v10 = vld [vmem:[#allocation4 + $0x10] sm:$0xff] }
 0x227   : > { %v735_v8 = vpop.f32.mrf.mxu1  ;;  %3284 = vmatmul.mubr.f32.gmra.mxu0 %v867_v7  ;;  %3416 = vmatprep.subr.mxu0 %v4143_v13 }
 0x228   : > { %v868_v20 = vmax.f32 %v726_v11, %v836_v16  ;;  %v736_v21 = vadd.f32 %v4223_v19, %v735_v8  ;;  %3417 = vmatpush3.msra.mxu0 %v4143_v13  ;;  %v839_v22 = vmul.f32 0.01, %v741_v18  ;;  %v1502_v13 = vld [vmem:[#allocation4 + $0x8] sm:$0xff] }
 0x229   : > { %v3214_v23 = vpop.f32.mrf.mxu1  ;;  %3418 = vmatprep.subr.mxu0 %v4147_v15 }
 0x22a   : > { %v838_v24 = vmul.f32 0.01, %v736_v21  ;;  %v751_v25 = vadd.f32 %v3214_v23, %v4223_v19  ;;  %3286 = vmatprep.mubr.f32.mxu0 %v868_v20  ;;  %3419 = vmatpush3.msra.mxu0 %v4147_v15  ;;  %v871_v30 = vmax.f32 %v741_v18, %v839_v22  ;;  %v1501_v15 = vld [vmem:[#allocation4] sm:$0xff] }
 0x22b   : > { %v745_v26 = vpop.f32.mrf.mxu1  ;;  %3287 = vmatmul.mubr.f32.gmra.mxu0 %v869_v9  ;;  %3420 = vmatprep.subr.mxu0 %v4151_v17 }
 0x22c   : > { %v870_v28 = vmax.f32 %v736_v21, %v838_v24  ;;  %v746_v29 = vadd.f32 %v4223_v19, %v745_v26  ;;  %3421 = vmatpush3.msra.mxu0 %v4151_v17  ;;  %v841_v31 = vmul.f32 0.01, %v751_v25 }
 0x22d   : > { %v3217_v32 = vpop.f32.mrf.mxu1  ;;  %3422 = vmatprep.subr.mxu0 %v1503_v10 }
 0x22e   : > { %v840_v33 = vmul.f32 0.01, %v746_v29  ;;  %v761_v34 = vadd.f32 %v3217_v32, %v4223_v19  ;;  %3289 = vmatprep.mubr.f32.mxu0 %v870_v28  ;;  %3423 = vmatpush3.msra.mxu0 %v1503_v10  ;;  %v873_v38 = vmax.f32 %v751_v25, %v841_v31  ;;  %v1487_v31 = vld [vmem:[%s4094_s8 + $0x110] sm:$0xff]  ;;  %v1489_v32 = vld [vmem:[%s4094_s8 + $0x120] sm:$0xff] }
 0x22f   : > { %v755_v35 = vpop.f32.mrf.mxu1  ;;  %3290 = vmatmul.mubr.f32.gmra.mxu0 %v871_v30  ;;  %3424 = vmatprep.subr.mxu0 %v1502_v13  ;;  %v1486_v30 = vld [vmem:[%s4094_s8 + $0x108] sm:$0xff] }
 0x230   : > { %v872_v36 = vmax.f32 %v746_v29, %v840_v33  ;;  %v756_v37 = vadd.f32 %v4223_v19, %v755_v35  ;;  %3425 = vmatpush3.msra.mxu0 %v1502_v13  ;;  %v843_v17 = vmul.f32 0.01, %v761_v34  ;;  %v1485_v13 = vld [vmem:[%s4094_s8 + $0x100] sm:$0xff]  ;;  %v1490_v33 = vld [vmem:[%s4094_s8 + $0x128] sm:$0xff] }
 0x231   : > { %v3220_v39 = vpop.f32.mrf.mxu1  ;;  %3426 = vmatprep.subr.mxu0 %v1501_v15  ;;  %v1203_v35 = vld [vmem:[#allocation4 + $0x180] sm:$0xff] }
 0x232   : > { %v842_v40 = vmul.f32 0.01, %v756_v37  ;;  %v771_v41 = vadd.f32 %v3220_v39, %v4223_v19  ;;  %3292 = vmatprep.mubr.f32.mxu0 %v872_v36  ;;  %3427 = vmatpush3.msra.mxu0 %v1501_v15  ;;  %v875_v45 = vmax.f32 %v761_v34, %v843_v17  ;;  %v1204_v34 = vld [vmem:[#allocation4 + $0x188] sm:$0xff]  ;;  %v1491_v15 = vld [vmem:[%s4094_s8 + $0x130] sm:$0xff]  ;;  %v1492_v36 = vld [vmem:[%s4094_s8 + $0x138] sm:$0xff] }
 0x233   : > { %v765_v42 = vpop.f32.mrf.mxu1  ;;  %3293 = vmatmul.mubr.f32.gmra.mxu0 %v873_v38  ;;  %3344 = vmatprep.subr.mxu1 %v1204_v34  ;;  %v1494_v38 = vld [vmem:[%s4094_s8 + $0x148] sm:$0xff]  ;;  %v1716_v17 = vld [vmem:[#allocation4 + $0xf8] sm:$0xff]  ;;  %v1495_v39 = vld [vmem:[%s4094_s8 + $0x150] sm:$0xff] }
 0x234   : > { %v874_v43 = vmax.f32 %v756_v37, %v842_v40  ;;  %v766_v44 = vadd.f32 %v4223_v19, %v765_v42  ;;  %v845_v46 = vmul.f32 0.01, %v771_v41  ;;  %3345 = vmatpush3.msra.mxu1 %v1204_v34  ;;  %v1493_v37 = vld [vmem:[%s4094_s8 + $0x140] sm:$0xff]  ;;  %v1496_v40 = vld [vmem:[%s4094_s8 + $0x158] sm:$0xff]  ;;  %v1498_v42 = vld [vmem:[%s4094_s8 + $0x168] sm:$0xff] }
 0x235   : > { %v3223_v47 = vpop.f32.mrf.mxu1  ;;  %3346 = vmatprep.subr.mxu1 %v1203_v35  ;;  %v1708_v34 = vld [vmem:[#allocation4 + $0xb8] sm:$0xff] }
 0x236   : > { %v844_v48 = vmul.f32 0.01, %v766_v44  ;;  %v781_v0 = vadd.f32 %v3223_v47, %v4223_v19  ;;  %3295 = vmatprep.mubr.f32.mxu0 %v874_v43  ;;  %v877_v52 = vmax.f32 %v771_v41, %v845_v46  ;;  %3347 = vmatpush3.msra.mxu1 %v1203_v35  ;;  %v1497_v41 = vld [vmem:[%s4094_s8 + $0x160] sm:$0xff]  ;;  %v1499_v43 = vld [vmem:[%s4094_s8 + $0x170] sm:$0xff] }
 0x237   : > { %v775_v49 = vpop.f32.mrf.mxu1  ;;  %3296 = vmatmul.mubr.f32.gmra.mxu0 %v875_v45  ;;  %3452 = vmatprep.subr.mxu1 %v1716_v17  ;;  %v4298_v45 = vld [vmem:[#allocation6 + $0x2] ss:$0 sm:$0xff] }
 0x238   : > { %v876_v50 = vmax.f32 %v766_v44, %v844_v48  ;;  %v776_v51 = vadd.f32 %v4223_v19, %v775_v49  ;;  %v847_v1 = vmul.f32 0.01, %v781_v0  ;;  %v1500_v44 = vld [vmem:[%s4094_s8 + $0x178] sm:$0xff] }
 0x239   : > { %v3226_v53 = vpop.f32.mrf.mxu1 }
 0x23a   : > { %v846_v54 = vmul.f32 0.01, %v776_v51  ;;  %v791_v2 = vadd.f32 %v3226_v53, %v4223_v19  ;;  %3298 = vmatprep.mubr.f32.mxu0 %v876_v50  ;;  %v879_v58 = vmax.f32 %v781_v0, %v847_v1 }
 0x23b   : > { %v785_v55 = vpop.f32.mrf.mxu1  ;;  %3299 = vmatmul.mubr.f32.gmra.mxu0 %v877_v52 }
 0x23c   : > { %v878_v56 = vmax.f32 %v776_v51, %v846_v54  ;;  %v786_v57 = vadd.f32 %v4223_v19, %v785_v55  ;;  %v849_v3 = vmul.f32 0.01, %v791_v2 }
 0x23d   : > { %v3229_v59 = vpop.f32.mrf.mxu1 }
 0x23e   : > { %v848_v27 = vmul.f32 0.01, %v786_v57  ;;  %v801_v5 = vadd.f32 %v3229_v59, %v4223_v19  ;;  %3301 = vmatprep.mubr.f32.mxu0 %v878_v56  ;;  %v881_v63 = vmax.f32 %v791_v2, %v849_v3  ;;  %v1715_v3 = vld [vmem:[#allocation4 + $0xf0] sm:$0xff] }
 0x23f   : > { %v795_v60 = vpop.f32.mrf.mxu1  ;;  %3302 = vmatmul.mubr.f32.gmra.mxu0 %v879_v58 }
 0x240   : > { %v880_v61 = vmax.f32 %v786_v57, %v848_v27  ;;  %v796_v62 = vadd.f32 %v4223_v19, %v795_v60  ;;  %v851_v6 = vmul.f32 0.01, %v801_v5  ;;  %v1714_v60 = vld [vmem:[#allocation4 + $0xe8] sm:$0xff] }
 0x241   : > { %v3232_v4 = vpop.f32.mrf.mxu1 }
 0x242   : > { %v850_v11 = vmul.f32 0.01, %v796_v62  ;;  %v811_v7 = vadd.f32 %v3232_v4, %v4223_v19  ;;  %3304 = vmatprep.mubr.f32.mxu0 %v880_v61  ;;  %v883_v18 = vmax.f32 %v801_v5, %v851_v6 }
 0x243   : > { %v805_v12 = vpop.f32.mrf.mxu1  ;;  %3305 = vmatmul.mubr.f32.gmra.mxu0 %v881_v63 }
 0x244   : > { %v882_v14 = vmax.f32 %v796_v62, %v850_v11  ;;  %v806_v16 = vadd.f32 %v4223_v19, %v805_v12  ;;  %v853_v8 = vmul.f32 0.01, %v811_v7  ;;  %v1713_v11 = vld [vmem:[#allocation4 + $0xe0] sm:$0xff] }
 0x245   : > { %v3235_v20 = vpop.f32.mrf.mxu1 }
 0x246   : > { %v852_v21 = vmul.f32 0.01, %v806_v16  ;;  %v821_v9 = vadd.f32 %v3235_v20, %v4223_v19  ;;  %3307 = vmatprep.mubr.f32.mxu0 %v882_v14  ;;  %v885_v25 = vmax.f32 %v811_v7, %v853_v8 }
 0x247   : > { %v815_v22 = vpop.f32.mrf.mxu1  ;;  %3308 = vmatmul.mubr.f32.gmra.mxu0 %v883_v18 }
 0x248   : > { %v884_v23 = vmax.f32 %v806_v16, %v852_v21  ;;  %v816_v24 = vadd.f32 %v4223_v19, %v815_v22  ;;  %v855_v10 = vmul.f32 0.01, %v821_v9  ;;  %v1488_v19 = vld [vmem:[%s4094_s8 + $0x118] sm:$0xff]  ;;  %v1711_v22 = vld [vmem:[#allocation4 + $0xd0] sm:$0xff] }
 0x249   : > { %v1712_v16 = vld [vmem:[#allocation4 + $0xd8] sm:$0xff] }
 0x24a   : > { %v854_v26 = vmul.f32 0.01, %v816_v24  ;;  %3310 = vmatprep.mubr.f32.mxu0 %v884_v23  ;;  %v887_v29 = vmax.f32 %v821_v9, %v855_v10  ;;  %v1710_v10 = vld [vmem:[#allocation4 + $0xc8] sm:$0xff] }
 0x24b   : > { %3311 = vmatmul.mubr.f32.gmra.mxu0 %v885_v25 }
 0x24c   : > { %v886_v28 = vmax.f32 %v816_v24, %v854_v26 }
 0x24e   : > { %3313 = vmatprep.mubr.f32.mxu0 %v886_v28 }
 0x24f   : > { %3314 = vmatmul.mubr.f32.gmra.mxu0 %v887_v29 }
 0x250   : > { %3428 = vmatprep.mubr.f32.mxu0 %v1485_v13 }
 0x253   : > { %3429 = vmatmul.mubr.f32.vlgmr.msra.gmra.mxu0 %v1486_v30 }
 0x254   : > { %3431 = vmatprep.mubr.f32.mxu0 %v1487_v31  ;;  %v1709_v31 = vld [vmem:[#allocation4 + $0xc0] sm:$0xff] }
 0x257   : > { %3432 = vmatmul.mubr.f32.gmra.mxu0 %v1488_v19 }
 0x258   : > { %3434 = vmatprep.mubr.f32.mxu0 %v1489_v32 }
 0x25b   : > { %3435 = vmatmul.mubr.f32.gmra.mxu0 %v1490_v33 }
 0x25c   : > { %3437 = vmatprep.mubr.f32.mxu0 %v1491_v15 }
 0x25f   : > { %3438 = vmatmul.mubr.f32.gmra.mxu0 %v1492_v36 }
 0x260   : > { %3440 = vmatprep.mubr.f32.mxu0 %v1493_v37 }
 0x263   : > { %3441 = vmatmul.mubr.f32.gmra.mxu0 %v1494_v38 }
 0x264   : > { %3443 = vmatprep.mubr.f32.mxu0 %v1495_v39 }
 0x267   : > { %3444 = vmatmul.mubr.f32.gmra.mxu0 %v1496_v40 }
 0x268   : > { %3446 = vmatprep.mubr.f32.mxu0 %v1497_v41 }
 0x26b   : > { %3447 = vmatmul.mubr.f32.gmra.mxu0 %v1498_v42  ;;  %v1706_v42 = vld [vmem:[#allocation4 + $0xa8] sm:$0xff] }
 0x26c   : > { %3449 = vmatprep.mubr.f32.mxu0 %v1499_v43 }
 0x26f   : > { %3450 = vmatmul.mubr.f32.gmra.mxu0 %v1500_v44 }
 0x2d3   : > { %v3270_v46 = vpop.f32.mrf.mxu0 }
 0x2d4   : > { %v985_v47 = vadd.f32 %v3270_v46, %v4298_v45 }
 0x2d5   : > { %v979_v48 = vpop.f32.mrf.mxu0 }
 0x2d6   : > { %v980_v0 = vadd.f32 %v4298_v45, %v979_v48  ;;  %v1139_v49 = vmul.f32 0.01, %v985_v47 }
 0x2d7   : > { %v3273_v50 = vpop.f32.mrf.mxu0 }
 0x2d8   : > { %v1138_v51 = vmul.f32 0.01, %v980_v0  ;;  %v995_v52 = vadd.f32 %v3273_v50, %v4298_v45  ;;  %v1171_v2 = vmax.f32 %v985_v47, %v1139_v49 }
 0x2d9   : > { %v989_v1 = vpop.f32.mrf.mxu0 }
 0x2da   : > { %v1170_v53 = vmax.f32 %v980_v0, %v1138_v51  ;;  %v990_v54 = vadd.f32 %v4298_v45, %v989_v1  ;;  %v1141_v55 = vmul.f32 0.01, %v995_v52  ;;  %v1705_v0 = vld [vmem:[#allocation4 + $0xa0] sm:$0xff] }
 0x2db   : > { %v3276_v56 = vpop.f32.mrf.mxu0 }
 0x2dc   : > { %v1140_v57 = vmul.f32 0.01, %v990_v54  ;;  %v1005_v58 = vadd.f32 %v3276_v56, %v4298_v45  ;;  %3348 = vmatprep.mubr.f32.mxu1 %v1170_v53  ;;  %v1173_v61 = vmax.f32 %v995_v52, %v1141_v55  ;;  %v1704_v52 = vld [vmem:[#allocation4 + $0x98] sm:$0xff]  ;;  %v1703_v56 = vld [vmem:[#allocation4 + $0x90] sm:$0xff] }
 0x2dd   : > { %v999_v59 = vpop.f32.mrf.mxu0  ;;  %3349 = vmatmul.mubr.f32.vlgmr.msra.gmra.mxu1 %v1171_v2 }
 0x2de   : > { %v1172_v27 = vmax.f32 %v990_v54, %v1140_v57  ;;  %v1000_v5 = vadd.f32 %v4298_v45, %v999_v59  ;;  %3453 = vmatpush3.msra.mxu1 %v1716_v17  ;;  %v1143_v62 = vmul.f32 0.01, %v1005_v58  ;;  %v1707_v17 = vld [vmem:[#allocation4 + $0xb0] sm:$0xff]  ;;  %v1702_v59 = vld [vmem:[#allocation4 + $0x88] sm:$0xff] }
 0x2df   : > { %v3279_v63 = vpop.f32.mrf.mxu0  ;;  %3454 = vmatprep.subr.mxu1 %v1715_v3 }
 0x2e0   : > { %v1142_v6 = vmul.f32 0.01, %v1000_v5  ;;  %v1015_v4 = vadd.f32 %v3279_v63, %v4298_v45  ;;  %3351 = vmatprep.mubr.f32.mxu1 %v1172_v27  ;;  %3455 = vmatpush3.msra.mxu1 %v1715_v3  ;;  %v1175_v18 = vmax.f32 %v1005_v58, %v1143_v62  ;;  %v1701_v63 = vld [vmem:[#allocation4 + $0x80] sm:$0xff] }
 0x2e1   : > { %v1009_v7 = vpop.f32.mrf.mxu0  ;;  %3352 = vmatmul.mubr.f32.gmra.mxu1 %v1173_v61  ;;  %3456 = vmatprep.subr.mxu1 %v1714_v60 }
 0x2e2   : > { %v1174_v12 = vmax.f32 %v1000_v5, %v1142_v6  ;;  %v1010_v14 = vadd.f32 %v4298_v45, %v1009_v7  ;;  %3457 = vmatpush3.msra.mxu1 %v1714_v60  ;;  %v1145_v8 = vmul.f32 0.01, %v1015_v4 }
 0x2e3   : > { %v3282_v20 = vpop.f32.mrf.mxu0  ;;  %3458 = vmatprep.subr.mxu1 %v1713_v11 }
 0x2e4   : > { %v1144_v21 = vmul.f32 0.01, %v1010_v14  ;;  %v1025_v9 = vadd.f32 %v3282_v20, %v4298_v45  ;;  %3354 = vmatprep.mubr.f32.mxu1 %v1174_v12  ;;  %3459 = vmatpush3.msra.mxu1 %v1713_v11  ;;  %v1177_v26 = vmax.f32 %v1015_v4, %v1145_v8 }
 0x2e5   : > { %v1019_v23 = vpop.f32.mrf.mxu0  ;;  %3355 = vmatmul.mubr.f32.gmra.mxu1 %v1175_v18  ;;  %3460 = vmatprep.subr.mxu1 %v1712_v16 }
 0x2e6   : > { %v1176_v24 = vmax.f32 %v1010_v14, %v1144_v21  ;;  %v1020_v25 = vadd.f32 %v4298_v45, %v1019_v23  ;;  %3461 = vmatpush3.msra.mxu1 %v1712_v16  ;;  %v1147_v28 = vmul.f32 0.01, %v1025_v9 }
 0x2e7   : > { %v3285_v29 = vpop.f32.mrf.mxu0  ;;  %3462 = vmatprep.subr.mxu1 %v1711_v22 }
 0x2e8   : > { %v1146_v13 = vmul.f32 0.01, %v1020_v25  ;;  %v1035_v30 = vadd.f32 %v3285_v29, %v4298_v45  ;;  %3357 = vmatprep.mubr.f32.mxu1 %v1176_v24  ;;  %3463 = vmatpush3.msra.mxu1 %v1711_v22  ;;  %v1179_v15 = vmax.f32 %v1025_v9, %v1147_v28 }
 0x2e9   : > { %v1029_v19 = vpop.f32.mrf.mxu0  ;;  %3358 = vmatmul.mubr.f32.gmra.mxu1 %v1177_v26  ;;  %3464 = vmatprep.subr.mxu1 %v1710_v10 }
 0x2ea   : > { %v1178_v32 = vmax.f32 %v1020_v25, %v1146_v13  ;;  %v1030_v33 = vadd.f32 %v4298_v45, %v1029_v19  ;;  %3465 = vmatpush3.msra.mxu1 %v1710_v10  ;;  %v1149_v35 = vmul.f32 0.01, %v1035_v30 }
 0x2eb   : > { %v3288_v36 = vpop.f32.mrf.mxu0  ;;  %3466 = vmatprep.subr.mxu1 %v1709_v31 }
 0x2ec   : > { %v1148_v37 = vmul.f32 0.01, %v1030_v33  ;;  %v1045_v38 = vadd.f32 %v3288_v36, %v4298_v45  ;;  %3360 = vmatprep.mubr.f32.mxu1 %v1178_v32  ;;  %3467 = vmatpush3.msra.mxu1 %v1709_v31  ;;  %v1181_v43 = vmax.f32 %v1035_v30, %v1149_v35 }
 0x2ed   : > { %v1039_v39 = vpop.f32.mrf.mxu0  ;;  %3361 = vmatmul.mubr.f32.gmra.mxu1 %v1179_v15  ;;  %3468 = vmatprep.subr.mxu1 %v1708_v34 }
 0x2ee   : > { %v1180_v40 = vmax.f32 %v1030_v33, %v1148_v37  ;;  %v1040_v41 = vadd.f32 %v4298_v45, %v1039_v39  ;;  %3469 = vmatpush3.msra.mxu1 %v1708_v34  ;;  %v1151_v44 = vmul.f32 0.01, %v1045_v38 }
 0x2ef   : > { %v3291_v46 = vpop.f32.mrf.mxu0  ;;  %3470 = vmatprep.subr.mxu1 %v1707_v17 }
 0x2f0   : > { %v1150_v47 = vmul.f32 0.01, %v1040_v41  ;;  %v1055_v48 = vadd.f32 %v3291_v46, %v4298_v45  ;;  %3363 = vmatprep.mubr.f32.mxu1 %v1180_v40  ;;  %3471 = vmatpush3.msra.mxu1 %v1707_v17  ;;  %v1183_v1 = vmax.f32 %v1045_v38, %v1151_v44 }
 0x2f1   : > { %v1049_v49 = vpop.f32.mrf.mxu0  ;;  %3364 = vmatmul.mubr.f32.gmra.mxu1 %v1181_v43  ;;  %3472 = vmatprep.subr.mxu1 %v1706_v42 }
 0x2f2   : > { %v1182_v50 = vmax.f32 %v1040_v41, %v1150_v47  ;;  %v1050_v51 = vadd.f32 %v4298_v45, %v1049_v49  ;;  %3473 = vmatpush3.msra.mxu1 %v1706_v42  ;;  %v1153_v53 = vmul.f32 0.01, %v1055_v48 }
 0x2f3   : > { %v3294_v54 = vpop.f32.mrf.mxu0  ;;  %3474 = vmatprep.subr.mxu1 %v1705_v0 }
 0x2f4   : > { %v1152_v2 = vmul.f32 0.01, %v1050_v51  ;;  %v1065_v55 = vadd.f32 %v3294_v54, %v4298_v45  ;;  %3366 = vmatprep.mubr.f32.mxu1 %v1182_v50  ;;  %3475 = vmatpush3.msra.mxu1 %v1705_v0  ;;  %v1185_v27 = vmax.f32 %v1055_v48, %v1153_v53  ;;  %v4331_v54 = vld [vmem:[#allocation6] ss:$0 sm:$0xff] }
 0x2f5   : > { %v1059_v57 = vpop.f32.mrf.mxu0  ;;  %3367 = vmatmul.mubr.f32.gmra.mxu1 %v1183_v1  ;;  %3476 = vmatprep.subr.mxu1 %v1704_v52 }
 0x2f6   : > { %v1184_v58 = vmax.f32 %v1050_v51, %v1152_v2  ;;  %v1060_v3 = vadd.f32 %v4298_v45, %v1059_v57  ;;  %3477 = vmatpush3.msra.mxu1 %v1704_v52  ;;  %v1155_v5 = vmul.f32 0.01, %v1065_v55 }
 0x2f7   : > { %v3297_v60 = vpop.f32.mrf.mxu0  ;;  %3478 = vmatprep.subr.mxu1 %v1703_v56 }
 0x2f8   : > { %v1154_v61 = vmul.f32 0.01, %v1060_v3  ;;  %v1075_v62 = vadd.f32 %v3297_v60, %v4298_v45  ;;  %3369 = vmatprep.mubr.f32.mxu1 %v1184_v58  ;;  %3479 = vmatpush3.msra.mxu1 %v1703_v56  ;;  %v1187_v7 = vmax.f32 %v1065_v55, %v1155_v5 }
 0x2f9   : > { %v1069_v6 = vpop.f32.mrf.mxu0  ;;  %3370 = vmatmul.mubr.f32.gmra.mxu1 %v1185_v27  ;;  %3480 = vmatprep.subr.mxu1 %v1702_v59 }
 0x2fa   : > { %v1186_v4 = vmax.f32 %v1060_v3, %v1154_v61  ;;  %v1070_v11 = vadd.f32 %v4298_v45, %v1069_v6  ;;  %3481 = vmatpush3.msra.mxu1 %v1702_v59  ;;  %v1157_v12 = vmul.f32 0.01, %v1075_v62 }
 0x2fb   : > { %v3300_v14 = vpop.f32.mrf.mxu0  ;;  %3482 = vmatprep.subr.mxu1 %v1701_v63 }
 0x2fc   : > { %v1156_v16 = vmul.f32 0.01, %v1070_v11  ;;  %v1085_v18 = vadd.f32 %v3300_v14, %v4298_v45  ;;  %3372 = vmatprep.mubr.f32.mxu1 %v1186_v4  ;;  %3483 = vmatpush3.msra.mxu1 %v1701_v63  ;;  %v1189_v9 = vmax.f32 %v1075_v62, %v1157_v12 }
 0x2fd   : > { %v1079_v8 = vpop.f32.mrf.mxu0  ;;  %3373 = vmatmul.mubr.f32.gmra.mxu1 %v1187_v7 }
 0x2fe   : > { %v1188_v20 = vmax.f32 %v1070_v11, %v1156_v16  ;;  %v1080_v21 = vadd.f32 %v4298_v45, %v1079_v8  ;;  %v1159_v22 = vmul.f32 0.01, %v1085_v18 }
 0x2ff   : > { %v3303_v23 = vpop.f32.mrf.mxu0 }
 0x300   : > { %v1158_v24 = vmul.f32 0.01, %v1080_v21  ;;  %v1095_v25 = vadd.f32 %v3303_v23, %v4298_v45  ;;  %3375 = vmatprep.mubr.f32.mxu1 %v1188_v20  ;;  %v1191_v29 = vmax.f32 %v1085_v18, %v1159_v22 }
 0x301   : > { %v1089_v10 = vpop.f32.mrf.mxu0  ;;  %3376 = vmatmul.mubr.f32.gmra.mxu1 %v1189_v9 }
 0x302   : > { %v1190_v26 = vmax.f32 %v1080_v21, %v1158_v24  ;;  %v1090_v28 = vadd.f32 %v4298_v45, %v1089_v10  ;;  %v1161_v13 = vmul.f32 0.01, %v1095_v25 }
 0x303   : > { %v3306_v30 = vpop.f32.mrf.mxu0 }
 0x304   : > { %v1160_v31 = vmul.f32 0.01, %v1090_v28  ;;  %v1105_v19 = vadd.f32 %v3306_v30, %v4298_v45  ;;  %3378 = vmatprep.mubr.f32.mxu1 %v1190_v26  ;;  %v1193_v15 = vmax.f32 %v1095_v25, %v1161_v13 }
 0x305   : > { %v1099_v32 = vpop.f32.mrf.mxu0  ;;  %3379 = vmatmul.mubr.f32.gmra.mxu1 %v1191_v29 }
 0x306   : > { %v1192_v33 = vmax.f32 %v1090_v28, %v1160_v31  ;;  %v1100_v34 = vadd.f32 %v4298_v45, %v1099_v32  ;;  %v1163_v35 = vmul.f32 0.01, %v1105_v19 }
 0x307   : > { %v3309_v36 = vpop.f32.mrf.mxu0 }
 0x308   : > { %v1162_v37 = vmul.f32 0.01, %v1100_v34  ;;  %v1115_v38 = vadd.f32 %v3309_v36, %v4298_v45  ;;  %3381 = vmatprep.mubr.f32.mxu1 %v1192_v33  ;;  %v1195_v41 = vmax.f32 %v1105_v19, %v1163_v35 }
 0x309   : > { %v1109_v17 = vpop.f32.mrf.mxu0  ;;  %3382 = vmatmul.mubr.f32.gmra.mxu1 %v1193_v15 }
 0x30a   : > { %v1194_v39 = vmax.f32 %v1100_v34, %v1162_v37  ;;  %v1110_v40 = vadd.f32 %v4298_v45, %v1109_v17  ;;  %v1165_v42 = vmul.f32 0.01, %v1115_v38 }
 0x30b   : > { %v3312_v43 = vpop.f32.mrf.mxu0 }
 0x30c   : > { %v1164_v44 = vmul.f32 0.01, %v1110_v40  ;;  %v1125_v46 = vadd.f32 %v3312_v43, %v4298_v45  ;;  %3384 = vmatprep.mubr.f32.mxu1 %v1194_v39  ;;  %v1197_v49 = vmax.f32 %v1115_v38, %v1165_v42 }
 0x30d   : > { %v1119_v47 = vpop.f32.mrf.mxu0  ;;  %3385 = vmatmul.mubr.f32.gmra.mxu1 %v1195_v41 }
 0x30e   : > { %v1196_v48 = vmax.f32 %v1110_v40, %v1164_v44  ;;  %v1120_v0 = vadd.f32 %v4298_v45, %v1119_v47  ;;  %v1167_v50 = vmul.f32 0.01, %v1125_v46 }
 0x30f   : > { %v3315_v51 = vpop.f32.mrf.mxu0 }
 0x310   : > { %v1166_v52 = vmul.f32 0.01, %v1120_v0  ;;  %v1135_v1 = vadd.f32 %v3315_v51, %v4298_v45  ;;  %3387 = vmatprep.mubr.f32.mxu1 %v1196_v48  ;;  %v1199_v56 = vmax.f32 %v1125_v46, %v1167_v50 }
 0x311   : > { %v1129_v53 = vpop.f32.mrf.mxu0  ;;  %3388 = vmatmul.mubr.f32.gmra.mxu1 %v1197_v49 }
 0x312   : > { %v1198_v2 = vmax.f32 %v1120_v0, %v1166_v52  ;;  %v1130_v55 = vadd.f32 %v4298_v45, %v1129_v53  ;;  %v1169_v57 = vmul.f32 0.01, %v1135_v1 }
 0x313   : > { %v3430_v58 = vpop.f32.mrf.mxu0 }
 0x314   : > { %v1168_v3 = vmul.f32 0.01, %v1130_v55  ;;  %v1596_v59 = vadd.f32 %v3430_v58, %v4331_v54  ;;  %3390 = vmatprep.mubr.f32.mxu1 %v1198_v2  ;;  %v1201_v61 = vmax.f32 %v1135_v1, %v1169_v57 }
 0x315   : > { %3391 = vmatmul.mubr.f32.gmra.mxu1 %v1199_v56  ;;  %v1590_v27 = vpop.f32.mrf.mxu0 }
 0x316   : > { %v1200_v5 = vmax.f32 %v1130_v55, %v1168_v3  ;;  %v1591_v60 = vadd.f32 %v4331_v54, %v1590_v27  ;;  %v1670_v62 = vmul.f32 0.01, %v1596_v59 }
 0x317   : > { %v3433_v63 = vpop.f32.mrf.mxu0 }
 0x318   : > { %v1669_v6 = vmul.f32 0.01, %v1591_v60  ;;  %v1606_v4 = vadd.f32 %v3433_v63, %v4331_v54  ;;  %3393 = vmatprep.mubr.f32.mxu1 %v1200_v5  ;;  %v1686_v12 = vmax.f32 %v1596_v59, %v1670_v62  ;;  %v1916_v5 = vld [vmem:[#allocation4 + $0x178] sm:$0xff]  ;;  %v1913_v62 = vld [vmem:[#allocation4 + $0x160] sm:$0xff]  ;;  %v1911_v63 = vld [vmem:[#allocation4 + $0x150] sm:$0xff] }
 0x319   : > { %3394 = vmatmul.mubr.f32.gmra.mxu1 %v1201_v61  ;;  %v1600_v45 = vpop.f32.mrf.mxu0  ;;  %3508 = vmatprep.subr.mxu0 %v1916_v5  ;;  %v1914_v61 = vld [vmem:[#allocation4 + $0x168] sm:$0xff] }
 0x31a   : > { %v1685_v11 = vmax.f32 %v1591_v60, %v1669_v6  ;;  %v1601_v7 = vadd.f32 %v4331_v54, %v1600_v45  ;;  %v1672_v14 = vmul.f32 0.01, %v1606_v4  ;;  %3509 = vmatpush3.msra.mxu0 %v1916_v5  ;;  %v1915_v60 = vld [vmem:[#allocation4 + $0x170] sm:$0xff]  ;;  %v1910_v6 = vld [vmem:[#allocation4 + $0x148] sm:$0xff]  ;;  %v1908_v45 = vld [vmem:[#allocation4 + $0x138] sm:$0xff] }
 0x31b   : > { %v3436_v16 = vpop.f32.mrf.mxu0  ;;  %3510 = vmatprep.subr.mxu0 %v1915_v60 }
 0x31c   : > { %v1671_v18 = vmul.f32 0.01, %v1601_v7  ;;  %v1616_v8 = vadd.f32 %v3436_v16, %v4331_v54  ;;  %3484 = vmatprep.mubr.f32.mxu1 %v1685_v11  ;;  %v1688_v22 = vmax.f32 %v1606_v4, %v1672_v14  ;;  %3511 = vmatpush3.msra.mxu0 %v1915_v60  ;;  %v1909_v4 = vld [vmem:[#allocation4 + $0x140] sm:$0xff]  ;;  %v1907_v11 = vld [vmem:[#allocation4 + $0x130] sm:$0xff]  ;;  %v1904_v14 = vld [vmem:[#allocation4 + $0x118] sm:$0xff] }
 0x31d   : > { %v1610_v20 = vpop.f32.mrf.mxu0  ;;  %3485 = vmatmul.mubr.f32.vlgmr.msra.gmra.mxu1 %v1686_v12  ;;  %3512 = vmatprep.subr.mxu0 %v1914_v61  ;;  %v1905_v12 = vld [vmem:[#allocation4 + $0x120] sm:$0xff]  ;;  %v1903_v16 = vld [vmem:[#allocation4 + $0x110] sm:$0xff] }
 0x31e   : > { %v1687_v21 = vmax.f32 %v1601_v7, %v1671_v18  ;;  %v1611_v9 = vadd.f32 %v4331_v54, %v1610_v20  ;;  %v1674_v23 = vmul.f32 0.01, %v1616_v8  ;;  %3513 = vmatpush3.msra.mxu0 %v1914_v61  ;;  %v1906_v7 = vld [vmem:[#allocation4 + $0x128] sm:$0xff]  ;;  %v2116_v20 = vld [vmem:[#allocation4 + $0x1f8] sm:$0xff] }
 0x31f   : > { %v3439_v24 = vpop.f32.mrf.mxu0  ;;  %3514 = vmatprep.subr.mxu0 %v1913_v62  ;;  %v1902_v18 = vld [vmem:[#allocation4 + $0x108] sm:$0xff]  ;;  %3564 = vmatprep.subr.mxu1 %v2116_v20 }
 0x320   : > { %v1673_v25 = vmul.f32 0.01, %v1611_v9  ;;  %v1626_v10 = vadd.f32 %v3439_v24, %v4331_v54  ;;  %3487 = vmatprep.mubr.f32.mxu1 %v1687_v21  ;;  %v1690_v13 = vmax.f32 %v1616_v8, %v1674_v23  ;;  %3515 = vmatpush3.msra.mxu0 %v1913_v62  ;;  %v1901_v8 = vld [vmem:[#allocation4 + $0x100] sm:$0xff]  ;;  %v2115_v21 = vld [vmem:[#allocation4 + $0x1f0] sm:$0xff]  ;;  %v2112_v23 = vld [vmem:[#allocation4 + $0x1d8] sm:$0xff] }
 0x321   : > { %v1620_v26 = vpop.f32.mrf.mxu0  ;;  %3488 = vmatmul.mubr.f32.gmra.mxu1 %v1688_v22  ;;  %v2113_v22 = vld [vmem:[#allocation4 + $0x1e0] sm:$0xff]  ;;  %v2111_v24 = vld [vmem:[#allocation4 + $0x1d0] sm:$0xff] }
 0x322   : > { %v1689_v28 = vmax.f32 %v1611_v9, %v1673_v25  ;;  %v1621_v29 = vadd.f32 %v4331_v54, %v1620_v26  ;;  %v1676_v30 = vmul.f32 0.01, %v1626_v10  ;;  %3565 = vmatpush3.msra.mxu1 %v2116_v20  ;;  %v2114_v9 = vld [vmem:[#allocation4 + $0x1e8] sm:$0xff]  ;;  %v2108_v26 = vld [vmem:[#allocation4 + $0x1b8] sm:$0xff] }
 0x323   : > { %v3442_v31 = vpop.f32.mrf.mxu0  ;;  %3566 = vmatprep.subr.mxu1 %v2115_v21  ;;  %v2110_v25 = vld [vmem:[#allocation4 + $0x1c8] sm:$0xff] }
 0x324   : > { %v1675_v19 = vmul.f32 0.01, %v1621_v29  ;;  %v1636_v32 = vadd.f32 %v3442_v31, %v4331_v54  ;;  %3490 = vmatprep.mubr.f32.mxu1 %v1689_v28  ;;  %v1692_v35 = vmax.f32 %v1626_v10, %v1676_v30  ;;  %3567 = vmatpush3.msra.mxu1 %v2115_v21  ;;  %v2109_v10 = vld [vmem:[#allocation4 + $0x1c0] sm:$0xff]  ;;  %v2107_v28 = vld [vmem:[#allocation4 + $0x1b0] sm:$0xff] }
 0x325   : > { %v1630_v33 = vpop.f32.mrf.mxu0  ;;  %3491 = vmatmul.mubr.f32.gmra.mxu1 %v1690_v13  ;;  %3568 = vmatprep.subr.mxu1 %v2114_v9  ;;  %v2105_v13 = vld [vmem:[#allocation4 + $0x1a0] sm:$0xff] }
 0x326   : > { %v1691_v34 = vmax.f32 %v1621_v29, %v1675_v19  ;;  %v1631_v15 = vadd.f32 %v4331_v54, %v1630_v33  ;;  %v1678_v36 = vmul.f32 0.01, %v1636_v32  ;;  %3569 = vmatpush3.msra.mxu1 %v2114_v9  ;;  %v2106_v29 = vld [vmem:[#allocation4 + $0x1a8] sm:$0xff]  ;;  %v4350_v30 = vld [vmem:[#allocation6 + $0x3] ss:$0 sm:$0xff] }
 0x327   : > { %v3445_v37 = vpop.f32.mrf.mxu0  ;;  %3570 = vmatprep.subr.mxu1 %v2113_v22 }
 0x328   : > { %v1677_v38 = vmul.f32 0.01, %v1631_v15  ;;  %v1646_v17 = vadd.f32 %v3445_v37, %v4331_v54  ;;  %3493 = vmatprep.mubr.f32.mxu1 %v1691_v34  ;;  %v1694_v42 = vmax.f32 %v1636_v32, %v1678_v36  ;;  %3571 = vmatpush3.msra.mxu1 %v2113_v22 }
 0x329   : > { %v1640_v39 = vpop.f32.mrf.mxu0  ;;  %3494 = vmatmul.mubr.f32.gmra.mxu1 %v1692_v35  ;;  %3572 = vmatprep.subr.mxu1 %v2112_v23 }
 0x32a   : > { %v1693_v40 = vmax.f32 %v1631_v15, %v1677_v38  ;;  %v1641_v41 = vadd.f32 %v4331_v54, %v1640_v39  ;;  %v1680_v43 = vmul.f32 0.01, %v1646_v17  ;;  %3573 = vmatpush3.msra.mxu1 %v2112_v23 }
 0x32b   : > { %v3448_v44 = vpop.f32.mrf.mxu0  ;;  %3574 = vmatprep.subr.mxu1 %v2111_v24 }
 0x32c   : > { %v1679_v46 = vmul.f32 0.01, %v1641_v41  ;;  %v1656_v47 = vadd.f32 %v3448_v44, %v4331_v54  ;;  %3496 = vmatprep.mubr.f32.mxu1 %v1693_v40  ;;  %v1696_v50 = vmax.f32 %v1646_v17, %v1680_v43  ;;  %3575 = vmatpush3.msra.mxu1 %v2111_v24 }
 0x32d   : > { %v1650_v48 = vpop.f32.mrf.mxu0  ;;  %3497 = vmatmul.mubr.f32.gmra.mxu1 %v1694_v42  ;;  %3576 = vmatprep.subr.mxu1 %v2110_v25 }
 0x32e   : > { %v1695_v0 = vmax.f32 %v1641_v41, %v1679_v46  ;;  %v1651_v49 = vadd.f32 %v4331_v54, %v1650_v48  ;;  %v1682_v51 = vmul.f32 0.01, %v1656_v47  ;;  %3577 = vmatpush3.msra.mxu1 %v2110_v25 }
 0x32f   : > { %v3451_v52 = vpop.f32.mrf.mxu0  ;;  %3578 = vmatprep.subr.mxu1 %v2109_v10 }
 0x330   : > { %v1681_v1 = vmul.f32 0.01, %v1651_v49  ;;  %v1666_v53 = vadd.f32 %v3451_v52, %v4331_v54  ;;  %3499 = vmatprep.mubr.f32.mxu1 %v1695_v0  ;;  %v1698_v57 = vmax.f32 %v1656_v47, %v1682_v51  ;;  %3579 = vmatpush3.msra.mxu1 %v2109_v10 }
 0x331   : > { %v1660_v2 = vpop.f32.mrf.mxu0  ;;  %3500 = vmatmul.mubr.f32.gmra.mxu1 %v1696_v50  ;;  %3580 = vmatprep.subr.mxu1 %v2108_v26 }
 0x332   : > { %v1697_v55 = vmax.f32 %v1651_v49, %v1681_v1  ;;  %v1661_v56 = vadd.f32 %v4331_v54, %v1660_v2  ;;  %v1684_v58 = vmul.f32 0.01, %v1666_v53  ;;  %v1912_v54 = vld [vmem:[#allocation4 + $0x158] sm:$0xff]  ;;  %3581 = vmatpush3.msra.mxu1 %v2108_v26 }
 0x333   : > { %3516 = vmatprep.subr.mxu0 %v1912_v54  ;;  %3582 = vmatprep.subr.mxu1 %v2107_v28 }
 0x334   : > { %v1683_v3 = vmul.f32 0.01, %v1661_v56  ;;  %3502 = vmatprep.mubr.f32.mxu1 %v1697_v55  ;;  %v1700_v27 = vmax.f32 %v1666_v53, %v1684_v58  ;;  %3517 = vmatpush3.msra.mxu0 %v1912_v54 }
 0x335   : > { %3503 = vmatmul.mubr.f32.gmra.mxu1 %v1698_v57  ;;  %3518 = vmatprep.subr.mxu0 %v1911_v63 }
 0x336   : > { %v1699_v59 = vmax.f32 %v1661_v56, %v1683_v3  ;;  %3519 = vmatpush3.msra.mxu0 %v1911_v63  ;;  %3583 = vmatpush3.msra.mxu1 %v2107_v28 }
 0x337   : > { %3520 = vmatprep.subr.mxu0 %v1910_v6  ;;  %3584 = vmatprep.subr.mxu1 %v2106_v29 }
 0x338   : > { %3505 = vmatprep.mubr.f32.mxu1 %v1699_v59  ;;  %3521 = vmatpush3.msra.mxu0 %v1910_v6 }
 0x339   : > { %3506 = vmatmul.mubr.f32.gmra.mxu1 %v1700_v27  ;;  %3522 = vmatprep.subr.mxu0 %v1909_v4 }
 0x33a   : > { %3523 = vmatpush3.msra.mxu0 %v1909_v4  ;;  %3585 = vmatpush3.msra.mxu1 %v2106_v29 }
 0x33b   : > { %3524 = vmatprep.subr.mxu0 %v1908_v45  ;;  %3586 = vmatprep.subr.mxu1 %v2105_v13 }
 0x33c   : > { %3525 = vmatpush3.msra.mxu0 %v1908_v45  ;;  %3587 = vmatpush3.msra.mxu1 %v2105_v13 }
 0x33d   : > { %3526 = vmatprep.subr.mxu0 %v1907_v11 }
 0x33e   : > { %3527 = vmatpush3.msra.mxu0 %v1907_v11 }
 0x33f   : > { %3528 = vmatprep.subr.mxu0 %v1906_v7 }
 0x340   : > { %3529 = vmatpush3.msra.mxu0 %v1906_v7 }
 0x341   : > { %3530 = vmatprep.subr.mxu0 %v1905_v12 }
 0x342   : > { %3531 = vmatpush3.msra.mxu0 %v1905_v12 }
 0x343   : > { %3532 = vmatprep.subr.mxu0 %v1904_v14 }
 0x344   : > { %3533 = vmatpush3.msra.mxu0 %v1904_v14 }
 0x345   : > { %3534 = vmatprep.subr.mxu0 %v1903_v16 }
 0x346   : > { %3535 = vmatpush3.msra.mxu0 %v1903_v16 }
 0x347   : > { %3536 = vmatprep.subr.mxu0 %v1902_v18 }
 0x348   : > { %3537 = vmatpush3.msra.mxu0 %v1902_v18 }
 0x349   : > { %3538 = vmatprep.subr.mxu0 %v1901_v8 }
 0x34a   : > { %3539 = vmatpush3.msra.mxu0 %v1901_v8 }
 0x39d   : > { %v3350_v31 = vpop.f32.mrf.mxu1 }
 0x39e   : > { %v1299_v19 = vadd.f32 %v3350_v31, %v4350_v30  ;;  %v4446_v31 = vld [vmem:[#allocation6 + $0x1] ss:$0 sm:$0xff] }
 0x39f   : > { %v1293_v32 = vpop.f32.mrf.mxu1 }
 0x3a0   : > { %1454 = vst.msk [vmem:[%s4354_s22 + $0x8] sm:$0xff] %vm1452_vm0, %v1299_v19  ;;  %v1294_v33 = vadd.f32 %v4350_v30, %v1293_v32 }
 0x3a1   : > { %v3353_v34 = vpop.f32.mrf.mxu1 }
 0x3a2   : > { %1453 = vst.msk [vmem:[%s4354_s22] sm:$0xff] %vm1452_vm0, %v1294_v33  ;;  %v1309_v15 = vadd.f32 %v3353_v34, %v4350_v30 }
 0x3a3   : > { %v1303_v35 = vpop.f32.mrf.mxu1 }
 0x3a4   : > { %1456 = vst.msk [vmem:[%s4354_s22 + $0x18] sm:$0xff] %vm1452_vm0, %v1309_v15  ;;  %v1304_v36 = vadd.f32 %v4350_v30, %v1303_v35 }
 0x3a5   : > { %v3356_v37 = vpop.f32.mrf.mxu1 }
 0x3a6   : > { %1455 = vst.msk [vmem:[%s4354_s22 + $0x10] sm:$0xff] %vm1452_vm0, %v1304_v36  ;;  %v1319_v38 = vadd.f32 %v3356_v37, %v4350_v30 }
 0x3a7   : > { %v1313_v17 = vpop.f32.mrf.mxu1 }
 0x3a8   : > { %1458 = vst.msk [vmem:[%s4354_s22 + $0x28] sm:$0xff] %vm1452_vm0, %v1319_v38  ;;  %v1314_v39 = vadd.f32 %v4350_v30, %v1313_v17 }
 0x3a9   : > { %v3359_v40 = vpop.f32.mrf.mxu1 }
 0x3aa   : > { %1457 = vst.msk [vmem:[%s4354_s22 + $0x20] sm:$0xff] %vm1452_vm0, %v1314_v39  ;;  %v1329_v41 = vadd.f32 %v3359_v40, %v4350_v30 }
 0x3ab   : > { %v1323_v42 = vpop.f32.mrf.mxu1 }
 0x3ac   : > { %1460 = vst.msk [vmem:[%s4354_s22 + $0x38] sm:$0xff] %vm1452_vm0, %v1329_v41  ;;  %v1324_v43 = vadd.f32 %v4350_v30, %v1323_v42 }
 0x3ad   : > { %v3362_v44 = vpop.f32.mrf.mxu1 }
 0x3ae   : > { %1459 = vst.msk [vmem:[%s4354_s22 + $0x30] sm:$0xff] %vm1452_vm0, %v1324_v43  ;;  %v1339_v46 = vadd.f32 %v3362_v44, %v4350_v30 }
 0x3af   : > { %v1333_v47 = vpop.f32.mrf.mxu1 }
 0x3b0   : > { %1462 = vst.msk [vmem:[%s4354_s22 + $0x48] sm:$0xff] %vm1452_vm0, %v1339_v46  ;;  %v1334_v48 = vadd.f32 %v4350_v30, %v1333_v47 }
 0x3b1   : > { %v3365_v0 = vpop.f32.mrf.mxu1 }
 0x3b2   : > { %1461 = vst.msk [vmem:[%s4354_s22 + $0x40] sm:$0xff] %vm1452_vm0, %v1334_v48  ;;  %v1349_v49 = vadd.f32 %v3365_v0, %v4350_v30 }
 0x3b3   : > { %v1343_v50 = vpop.f32.mrf.mxu1 }
 0x3b4   : > { %1464 = vst.msk [vmem:[%s4354_s22 + $0x58] sm:$0xff] %vm1452_vm0, %v1349_v49  ;;  %v1344_v51 = vadd.f32 %v4350_v30, %v1343_v50 }
 0x3b5   : > { %v3368_v52 = vpop.f32.mrf.mxu1 }
 0x3b6   : > { %1463 = vst.msk [vmem:[%s4354_s22 + $0x50] sm:$0xff] %vm1452_vm0, %v1344_v51  ;;  %v1359_v1 = vadd.f32 %v3368_v52, %v4350_v30 }
 0x3b7   : > { %v1353_v53 = vpop.f32.mrf.mxu1 }
 0x3b8   : > { %1466 = vst.msk [vmem:[%s4354_s22 + $0x68] sm:$0xff] %vm1452_vm0, %v1359_v1  ;;  %v1354_v2 = vadd.f32 %v4350_v30, %v1353_v53 }
 0x3b9   : > { %v3371_v55 = vpop.f32.mrf.mxu1 }
 0x3ba   : > { %1465 = vst.msk [vmem:[%s4354_s22 + $0x60] sm:$0xff] %vm1452_vm0, %v1354_v2  ;;  %v1369_v56 = vadd.f32 %v3371_v55, %v4350_v30 }
 0x3bb   : > { %v1363_v57 = vpop.f32.mrf.mxu1 }
 0x3bc   : > { %1468 = vst.msk [vmem:[%s4354_s22 + $0x78] sm:$0xff] %vm1452_vm0, %v1369_v56  ;;  %v1364_v58 = vadd.f32 %v4350_v30, %v1363_v57 }
 0x3bd   : > { %v3374_v3 = vpop.f32.mrf.mxu1 }
 0x3be   : > { %1467 = vst.msk [vmem:[%s4354_s22 + $0x70] sm:$0xff] %vm1452_vm0, %v1364_v58  ;;  %v1379_v59 = vadd.f32 %v3374_v3, %v4350_v30 }
 0x3bf   : > { %v1373_v27 = vpop.f32.mrf.mxu1 }
 0x3c0   : > { %1470 = vst.msk [vmem:[%s4354_s22 + $0x88] sm:$0xff] %vm1452_vm0, %v1379_v59  ;;  %v1374_v5 = vadd.f32 %v4350_v30, %v1373_v27 }
 0x3c1   : > { %v3377_v60 = vpop.f32.mrf.mxu1 }
 0x3c2   : > { %1469 = vst.msk [vmem:[%s4354_s22 + $0x80] sm:$0xff] %vm1452_vm0, %v1374_v5  ;;  %v1389_v61 = vadd.f32 %v3377_v60, %v4350_v30 }
 0x3c3   : > { %v1383_v62 = vpop.f32.mrf.mxu1 }
 0x3c4   : > { %1472 = vst.msk [vmem:[%s4354_s22 + $0x98] sm:$0xff] %vm1452_vm0, %v1389_v61  ;;  %v1384_v54 = vadd.f32 %v4350_v30, %v1383_v62 }
 0x3c5   : > { %v3380_v63 = vpop.f32.mrf.mxu1 }
 0x3c6   : > { %1471 = vst.msk [vmem:[%s4354_s22 + $0x90] sm:$0xff] %vm1452_vm0, %v1384_v54  ;;  %v1399_v6 = vadd.f32 %v3380_v63, %v4350_v30 }
 0x3c7   : > { %v1393_v4 = vpop.f32.mrf.mxu1 }
 0x3c8   : > { %1474 = vst.msk [vmem:[%s4354_s22 + $0xa8] sm:$0xff] %vm1452_vm0, %v1399_v6  ;;  %v1394_v45 = vadd.f32 %v4350_v30, %v1393_v4 }
 0x3c9   : > { %v3383_v11 = vpop.f32.mrf.mxu1 }
 0x3ca   : > { %1473 = vst.msk [vmem:[%s4354_s22 + $0xa0] sm:$0xff] %vm1452_vm0, %v1394_v45  ;;  %v1409_v7 = vadd.f32 %v3383_v11, %v4350_v30 }
 0x3cb   : > { %v1403_v12 = vpop.f32.mrf.mxu1 }
 0x3cc   : > { %1476 = vst.msk [vmem:[%s4354_s22 + $0xb8] sm:$0xff] %vm1452_vm0, %v1409_v7  ;;  %v1404_v14 = vadd.f32 %v4350_v30, %v1403_v12 }
 0x3cd   : > { %v3386_v16 = vpop.f32.mrf.mxu1 }
 0x3ce   : > { %1475 = vst.msk [vmem:[%s4354_s22 + $0xb0] sm:$0xff] %vm1452_vm0, %v1404_v14  ;;  %v1419_v18 = vadd.f32 %v3386_v16, %v4350_v30 }
 0x3cf   : > { %v1413_v8 = vpop.f32.mrf.mxu1 }
 0x3d0   : > { %1478 = vst.msk [vmem:[%s4354_s22 + $0xc8] sm:$0xff] %vm1452_vm0, %v1419_v18  ;;  %v1414_v20 = vadd.f32 %v4350_v30, %v1413_v8 }
 0x3d1   : > { %v3389_v21 = vpop.f32.mrf.mxu1 }
 0x3d2   : > { %1477 = vst.msk [vmem:[%s4354_s22 + $0xc0] sm:$0xff] %vm1452_vm0, %v1414_v20  ;;  %v1429_v9 = vadd.f32 %v3389_v21, %v4350_v30 }
 0x3d3   : > { %v1423_v22 = vpop.f32.mrf.mxu1 }
 0x3d4   : > { %1480 = vst.msk [vmem:[%s4354_s22 + $0xd8] sm:$0xff] %vm1452_vm0, %v1429_v9  ;;  %v1424_v23 = vadd.f32 %v4350_v30, %v1423_v22 }
 0x3d5   : > { %v3392_v24 = vpop.f32.mrf.mxu1 }
 0x3d6   : > { %1479 = vst.msk [vmem:[%s4354_s22 + $0xd0] sm:$0xff] %vm1452_vm0, %v1424_v23  ;;  %v1439_v25 = vadd.f32 %v3392_v24, %v4350_v30 }
 0x3d7   : > { %v1433_v10 = vpop.f32.mrf.mxu1 }
 0x3d8   : > { %1482 = vst.msk [vmem:[%s4354_s22 + $0xe8] sm:$0xff] %vm1452_vm0, %v1439_v25  ;;  %v1434_v26 = vadd.f32 %v4350_v30, %v1433_v10 }
 0x3d9   : > { %v3395_v28 = vpop.f32.mrf.mxu1 }
 0x3da   : > { %1481 = vst.msk [vmem:[%s4354_s22 + $0xe0] sm:$0xff] %vm1452_vm0, %v1434_v26  ;;  %v1449_v29 = vadd.f32 %v3395_v28, %v4350_v30 }
 0x3db   : > { %v1443_v13 = vpop.f32.mrf.mxu1 }
 0x3dc   : > { %1484 = vst.msk [vmem:[%s4354_s22 + $0xf8] sm:$0xff] %vm1452_vm0, %v1449_v29  ;;  %v1444_v19 = vadd.f32 %v4350_v30, %v1443_v13 }
 0x3dd   : > { %v3486_v32 = vpop.f32.mrf.mxu1 }
 0x3de   : > { %1483 = vst.msk [vmem:[%s4354_s22 + $0xf0] sm:$0xff] %vm1452_vm0, %v1444_v19  ;;  %v1796_v33 = vadd.f32 %v3486_v32, %v4446_v31 }
 0x3df   : > { %v1790_v34 = vpop.f32.mrf.mxu1 }
 0x3e0   : > { %v1791_v15 = vadd.f32 %v4446_v31, %v1790_v34  ;;  %v1870_v35 = vmul.f32 0.01, %v1796_v33  ;;  %v2104_v34 = vld [vmem:[#allocation4 + $0x198] sm:$0xff] }
 0x3e1   : > { %v3489_v36 = vpop.f32.mrf.mxu1  ;;  %3588 = vmatprep.subr.mxu1 %v2104_v34 }
 0x3e2   : > { %v1869_v37 = vmul.f32 0.01, %v1791_v15  ;;  %v1806_v38 = vadd.f32 %v3489_v36, %v4446_v31  ;;  %v1886_v41 = vmax.f32 %v1796_v33, %v1870_v35  ;;  %3589 = vmatpush3.msra.mxu1 %v2104_v34  ;;  %v2102_v35 = vld [vmem:[#allocation4 + $0x188] sm:$0xff]  ;;  %v2101_v36 = vld [vmem:[#allocation4 + $0x180] sm:$0xff] }
 0x3e3   : > { %v1800_v17 = vpop.f32.mrf.mxu1 }
 0x3e4   : > { %v1885_v39 = vmax.f32 %v1791_v15, %v1869_v37  ;;  %v1801_v40 = vadd.f32 %v4446_v31, %v1800_v17  ;;  %v1872_v42 = vmul.f32 0.01, %v1806_v38  ;;  %v2103_v15 = vld [vmem:[#allocation4 + $0x190] sm:$0xff] }
 0x3e5   : > { %v3492_v43 = vpop.f32.mrf.mxu1  ;;  %3590 = vmatprep.subr.mxu1 %v2103_v15 }
 0x3e6   : > { %v1871_v44 = vmul.f32 0.01, %v1801_v40  ;;  %v1816_v46 = vadd.f32 %v3492_v43, %v4446_v31  ;;  %3540 = vmatprep.mubr.f32.mxu0 %v1885_v39  ;;  %v1888_v49 = vmax.f32 %v1806_v38, %v1872_v42  ;;  %3591 = vmatpush3.msra.mxu1 %v2103_v15 }
 0x3e7   : > { %v1810_v47 = vpop.f32.mrf.mxu1  ;;  %3541 = vmatmul.mubr.f32.vlgmr.msra.gmra.mxu0 %v1886_v41  ;;  %3592 = vmatprep.subr.mxu1 %v2102_v35 }
 0x3e8   : > { %v1887_v48 = vmax.f32 %v1801_v40, %v1871_v44  ;;  %v1811_v0 = vadd.f32 %v4446_v31, %v1810_v47  ;;  %v1874_v50 = vmul.f32 0.01, %v1816_v46  ;;  %3593 = vmatpush3.msra.mxu1 %v2102_v35 }
 0x3e9   : > { %v3495_v51 = vpop.f32.mrf.mxu1  ;;  %3594 = vmatprep.subr.mxu1 %v2101_v36 }
 0x3ea   : > { %v1873_v52 = vmul.f32 0.01, %v1811_v0  ;;  %v1826_v1 = vadd.f32 %v3495_v51, %v4446_v31  ;;  %3543 = vmatprep.mubr.f32.mxu0 %v1887_v48  ;;  %v1890_v56 = vmax.f32 %v1816_v46, %v1874_v50  ;;  %3595 = vmatpush3.msra.mxu1 %v2101_v36 }
 0x3eb   : > { %v1820_v53 = vpop.f32.mrf.mxu1  ;;  %3544 = vmatmul.mubr.f32.gmra.mxu0 %v1888_v49 }
 0x3ec   : > { %v1889_v2 = vmax.f32 %v1811_v0, %v1873_v52  ;;  %v1821_v55 = vadd.f32 %v4446_v31, %v1820_v53  ;;  %v1876_v57 = vmul.f32 0.01, %v1826_v1 }
 0x3ed   : > { %v3498_v58 = vpop.f32.mrf.mxu1 }
 0x3ee   : > { %v1875_v3 = vmul.f32 0.01, %v1821_v55  ;;  %v1836_v59 = vadd.f32 %v3498_v58, %v4446_v31  ;;  %3546 = vmatprep.mubr.f32.mxu0 %v1889_v2  ;;  %v1892_v61 = vmax.f32 %v1826_v1, %v1876_v57 }
 0x3ef   : > { %v1830_v27 = vpop.f32.mrf.mxu1  ;;  %3547 = vmatmul.mubr.f32.gmra.mxu0 %v1890_v56 }
 0x3f0   : > { %v1891_v5 = vmax.f32 %v1821_v55, %v1875_v3  ;;  %v1831_v60 = vadd.f32 %v4446_v31, %v1830_v27  ;;  %v1878_v62 = vmul.f32 0.01, %v1836_v59 }
 0x3f1   : > { %v3501_v54 = vpop.f32.mrf.mxu1 }
 0x3f2   : > { %v1877_v63 = vmul.f32 0.01, %v1831_v60  ;;  %v1846_v6 = vadd.f32 %v3501_v54, %v4446_v31  ;;  %3549 = vmatprep.mubr.f32.mxu0 %v1891_v5  ;;  %v1894_v7 = vmax.f32 %v1836_v59, %v1878_v62 }
 0x3f3   : > { %v1840_v4 = vpop.f32.mrf.mxu1  ;;  %3550 = vmatmul.mubr.f32.gmra.mxu0 %v1892_v61 }
 0x3f4   : > { %v1893_v45 = vmax.f32 %v1831_v60, %v1877_v63  ;;  %v1841_v11 = vadd.f32 %v4446_v31, %v1840_v4  ;;  %v1880_v12 = vmul.f32 0.01, %v1846_v6 }
 0x3f5   : > { %v3504_v14 = vpop.f32.mrf.mxu1 }
 0x3f6   : > { %v1879_v16 = vmul.f32 0.01, %v1841_v11  ;;  %v1856_v18 = vadd.f32 %v3504_v14, %v4446_v31  ;;  %3552 = vmatprep.mubr.f32.mxu0 %v1893_v45  ;;  %v1896_v9 = vmax.f32 %v1846_v6, %v1880_v12 }
 0x3f7   : > { %v1850_v8 = vpop.f32.mrf.mxu1  ;;  %3553 = vmatmul.mubr.f32.gmra.mxu0 %v1894_v7 }
 0x3f8   : > { %v1895_v20 = vmax.f32 %v1841_v11, %v1879_v16  ;;  %v1851_v21 = vadd.f32 %v4446_v31, %v1850_v8  ;;  %v1882_v22 = vmul.f32 0.01, %v1856_v18 }
 0x3f9   : > { %v3507_v23 = vpop.f32.mrf.mxu1 }
 0x3fa   : > { %v1881_v24 = vmul.f32 0.01, %v1851_v21  ;;  %v1866_v25 = vadd.f32 %v3507_v23, %v4446_v31  ;;  %3555 = vmatprep.mubr.f32.mxu0 %v1895_v20  ;;  %v1898_v29 = vmax.f32 %v1856_v18, %v1882_v22 }
 0x3fb   : > { %v1860_v10 = vpop.f32.mrf.mxu1  ;;  %3556 = vmatmul.mubr.f32.gmra.mxu0 %v1896_v9 }
 0x3fc   : > { %v1897_v26 = vmax.f32 %v1851_v21, %v1881_v24  ;;  %v1861_v28 = vadd.f32 %v4446_v31, %v1860_v10  ;;  %v1884_v13 = vmul.f32 0.01, %v1866_v25  ;;  %v4469_v31 = vld [vmem:[#allocation6 + $0x2] ss:$0 sm:$0xff] }
 0x3fe   : > { %v1883_v19 = vmul.f32 0.01, %v1861_v28  ;;  %3558 = vmatprep.mubr.f32.mxu0 %v1897_v26  ;;  %v1900_v33 = vmax.f32 %v1866_v25, %v1884_v13 }
 0x3ff   : > { %3559 = vmatmul.mubr.f32.gmra.mxu0 %v1898_v29 }
 0x400   : > { %v1899_v32 = vmax.f32 %v1861_v28, %v1883_v19 }
 0x402   : > { %3561 = vmatprep.mubr.f32.mxu0 %v1899_v32 }
 0x403   : > { %3562 = vmatmul.mubr.f32.gmra.mxu0 %v1900_v33 }
 0x4a7   : > { %v3542_v37 = vpop.f32.mrf.mxu0 }
 0x4a8   : > { %v1996_v38 = vadd.f32 %v3542_v37, %v4469_v31 }
 0x4a9   : > { %v1990_v17 = vpop.f32.mrf.mxu0 }
 0x4aa   : > { %v1991_v39 = vadd.f32 %v4469_v31, %v1990_v17  ;;  %v2070_v40 = vmul.f32 0.01, %v1996_v38 }
 0x4ab   : > { %v3545_v41 = vpop.f32.mrf.mxu0 }
 0x4ac   : > { %v2069_v42 = vmul.f32 0.01, %v1991_v39  ;;  %v2006_v43 = vadd.f32 %v3545_v41, %v4469_v31  ;;  %v2086_v48 = vmax.f32 %v1996_v38, %v2070_v40 }
 0x4ad   : > { %v2000_v44 = vpop.f32.mrf.mxu0 }
 0x4ae   : > { %v2085_v46 = vmax.f32 %v1991_v39, %v2069_v42  ;;  %v2001_v47 = vadd.f32 %v4469_v31, %v2000_v44  ;;  %v2072_v0 = vmul.f32 0.01, %v2006_v43 }
 0x4af   : > { %v3548_v49 = vpop.f32.mrf.mxu0 }
 0x4b0   : > { %v2071_v50 = vmul.f32 0.01, %v2001_v47  ;;  %v2016_v51 = vadd.f32 %v3548_v49, %v4469_v31  ;;  %3596 = vmatprep.mubr.f32.mxu1 %v2085_v46  ;;  %v2088_v2 = vmax.f32 %v2006_v43, %v2072_v0 }
 0x4b1   : > { %v2010_v52 = vpop.f32.mrf.mxu0  ;;  %3597 = vmatmul.mubr.f32.vlgmr.msra.gmra.mxu1 %v2086_v48 }
 0x4b2   : > { %v2087_v1 = vmax.f32 %v2001_v47, %v2071_v50  ;;  %v2011_v53 = vadd.f32 %v4469_v31, %v2010_v52  ;;  %v2074_v55 = vmul.f32 0.01, %v2016_v51 }
 0x4b3   : > { %v3551_v56 = vpop.f32.mrf.mxu0 }
 0x4b4   : > { %v2073_v57 = vmul.f32 0.01, %v2011_v53  ;;  %v2026_v58 = vadd.f32 %v3551_v56, %v4469_v31  ;;  %3599 = vmatprep.mubr.f32.mxu1 %v2087_v1  ;;  %v2090_v5 = vmax.f32 %v2016_v51, %v2074_v55 }
 0x4b5   : > { %v2020_v3 = vpop.f32.mrf.mxu0  ;;  %3600 = vmatmul.mubr.f32.gmra.mxu1 %v2088_v2 }
 0x4b6   : > { %v2089_v59 = vmax.f32 %v2011_v53, %v2073_v57  ;;  %v2021_v27 = vadd.f32 %v4469_v31, %v2020_v3  ;;  %v2076_v60 = vmul.f32 0.01, %v2026_v58 }
 0x4b7   : > { %v3554_v61 = vpop.f32.mrf.mxu0 }
 0x4b8   : > { %v2075_v62 = vmul.f32 0.01, %v2021_v27  ;;  %v2036_v54 = vadd.f32 %v3554_v61, %v4469_v31  ;;  %3602 = vmatprep.mubr.f32.mxu1 %v2089_v59  ;;  %v2092_v45 = vmax.f32 %v2026_v58, %v2076_v60 }
 0x4b9   : > { %v2030_v63 = vpop.f32.mrf.mxu0  ;;  %3603 = vmatmul.mubr.f32.gmra.mxu1 %v2090_v5 }
 0x4ba   : > { %v2091_v6 = vmax.f32 %v2021_v27, %v2075_v62  ;;  %v2031_v4 = vadd.f32 %v4469_v31, %v2030_v63  ;;  %v2078_v11 = vmul.f32 0.01, %v2036_v54 }
 0x4bb   : > { %v3557_v7 = vpop.f32.mrf.mxu0 }
 0x4bc   : > { %v2077_v12 = vmul.f32 0.01, %v2031_v4  ;;  %v2046_v14 = vadd.f32 %v3557_v7, %v4469_v31  ;;  %3605 = vmatprep.mubr.f32.mxu1 %v2091_v6  ;;  %v2094_v20 = vmax.f32 %v2036_v54, %v2078_v11 }
 0x4bd   : > { %v2040_v16 = vpop.f32.mrf.mxu0  ;;  %3606 = vmatmul.mubr.f32.gmra.mxu1 %v2092_v45 }
 0x4be   : > { %v2093_v18 = vmax.f32 %v2031_v4, %v2077_v12  ;;  %v2041_v8 = vadd.f32 %v4469_v31, %v2040_v16  ;;  %v2080_v21 = vmul.f32 0.01, %v2046_v14 }
 0x4bf   : > { %v3560_v9 = vpop.f32.mrf.mxu0 }
 0x4c0   : > { %v2079_v22 = vmul.f32 0.01, %v2041_v8  ;;  %v2056_v23 = vadd.f32 %v3560_v9, %v4469_v31  ;;  %3608 = vmatprep.mubr.f32.mxu1 %v2093_v18  ;;  %v2096_v26 = vmax.f32 %v2046_v14, %v2080_v21 }
 0x4c1   : > { %v2050_v24 = vpop.f32.mrf.mxu0  ;;  %3609 = vmatmul.mubr.f32.gmra.mxu1 %v2094_v20 }
 0x4c2   : > { %v2095_v25 = vmax.f32 %v2041_v8, %v2079_v22  ;;  %v2051_v10 = vadd.f32 %v4469_v31, %v2050_v24  ;;  %v2082_v28 = vmul.f32 0.01, %v2056_v23 }
 0x4c3   : > { %v3563_v29 = vpop.f32.mrf.mxu0 }
 0x4c4   : > { %v2081_v13 = vmul.f32 0.01, %v2051_v10  ;;  %v2066_v19 = vadd.f32 %v3563_v29, %v4469_v31  ;;  %3611 = vmatprep.mubr.f32.mxu1 %v2095_v25  ;;  %v2098_v15 = vmax.f32 %v2056_v23, %v2082_v28 }
 0x4c5   : > { %v2060_v32 = vpop.f32.mrf.mxu0  ;;  %3612 = vmatmul.mubr.f32.gmra.mxu1 %v2096_v26 }
 0x4c6   : > { %v2097_v33 = vmax.f32 %v2051_v10, %v2081_v13  ;;  %v2061_v34 = vadd.f32 %v4469_v31, %v2060_v32  ;;  %v2084_v35 = vmul.f32 0.01, %v2066_v19 }
 0x4c8   : > { %v2083_v36 = vmul.f32 0.01, %v2061_v34  ;;  %3614 = vmatprep.mubr.f32.mxu1 %v2097_v33  ;;  %v2100_v38 = vmax.f32 %v2066_v19, %v2084_v35 }
 0x4c9   : > { %3615 = vmatmul.mubr.f32.gmra.mxu1 %v2098_v15 }
 0x4ca   : > { %v2099_v37 = vmax.f32 %v2061_v34, %v2083_v36 }
 0x4cc   : > { %3617 = vmatprep.mubr.f32.mxu1 %v2099_v37 }
 0x4cd   : > { %3618 = vmatmul.mubr.f32.gmra.mxu1 %v2100_v38 }
 0x571   : > { %v3598_v17 = vpop.f32.mrf.mxu1 }
 0x572   : > { %v2196_v39 = vadd.f32 %v3598_v17, %v4350_v30 }
 0x573   : > { %v2190_v40 = vpop.f32.mrf.mxu1 }
 0x574   : > { %2270 = vst.msk [vmem:[%s4354_s22 + $0x108] sm:$0xff] %vm1452_vm0, %v2196_v39  ;;  %v2191_v31 = vadd.f32 %v4350_v30, %v2190_v40 }
 0x575   : > { %v3601_v41 = vpop.f32.mrf.mxu1 }
 0x576   : > { %2269 = vst.msk [vmem:[%s4354_s22 + $0x100] sm:$0xff] %vm1452_vm0, %v2191_v31  ;;  %v2206_v42 = vadd.f32 %v3601_v41, %v4350_v30 }
 0x577   : > { %v2200_v43 = vpop.f32.mrf.mxu1 }
 0x578   : > { %2272 = vst.msk [vmem:[%s4354_s22 + $0x118] sm:$0xff] %vm1452_vm0, %v2206_v42  ;;  %v2201_v44 = vadd.f32 %v4350_v30, %v2200_v43 }
 0x579   : > { %v3604_v46 = vpop.f32.mrf.mxu1 }
 0x57a   : > { %2271 = vst.msk [vmem:[%s4354_s22 + $0x110] sm:$0xff] %vm1452_vm0, %v2201_v44  ;;  %v2216_v47 = vadd.f32 %v3604_v46, %v4350_v30 }
 0x57b   : > { %v2210_v48 = vpop.f32.mrf.mxu1 }
 0x57c   : > { %2274 = vst.msk [vmem:[%s4354_s22 + $0x128] sm:$0xff] %vm1452_vm0, %v2216_v47  ;;  %v2211_v0 = vadd.f32 %v4350_v30, %v2210_v48 }
 0x57d   : > { %v3607_v49 = vpop.f32.mrf.mxu1 }
 0x57e   : > { %2273 = vst.msk [vmem:[%s4354_s22 + $0x120] sm:$0xff] %vm1452_vm0, %v2211_v0  ;;  %v2226_v50 = vadd.f32 %v3607_v49, %v4350_v30 }
 0x57f   : > { %v2220_v51 = vpop.f32.mrf.mxu1 }
 0x580   : > { %2276 = vst.msk [vmem:[%s4354_s22 + $0x138] sm:$0xff] %vm1452_vm0, %v2226_v50  ;;  %v2221_v52 = vadd.f32 %v4350_v30, %v2220_v51 }
 0x581   : > { %v3610_v1 = vpop.f32.mrf.mxu1 }
 0x582   : > { %2275 = vst.msk [vmem:[%s4354_s22 + $0x130] sm:$0xff] %vm1452_vm0, %v2221_v52  ;;  %v2236_v53 = vadd.f32 %v3610_v1, %v4350_v30 }
 0x583   : > { %v2230_v2 = vpop.f32.mrf.mxu1 }
 0x584   : > { %2278 = vst.msk [vmem:[%s4354_s22 + $0x148] sm:$0xff] %vm1452_vm0, %v2236_v53  ;;  %v2231_v55 = vadd.f32 %v4350_v30, %v2230_v2 }
 0x585   : > { %v3613_v56 = vpop.f32.mrf.mxu1 }
 0x586   : > { %2277 = vst.msk [vmem:[%s4354_s22 + $0x140] sm:$0xff] %vm1452_vm0, %v2231_v55  ;;  %v2246_v57 = vadd.f32 %v3613_v56, %v4350_v30 }
 0x587   : > { %v2240_v58 = vpop.f32.mrf.mxu1 }
 0x588   : > { %2280 = vst.msk [vmem:[%s4354_s22 + $0x158] sm:$0xff] %vm1452_vm0, %v2246_v57  ;;  %v2241_v3 = vadd.f32 %v4350_v30, %v2240_v58 }
 0x589   : > { %v3616_v59 = vpop.f32.mrf.mxu1 }
 0x58a   : > { %2279 = vst.msk [vmem:[%s4354_s22 + $0x150] sm:$0xff] %vm1452_vm0, %v2241_v3  ;;  %v2256_v27 = vadd.f32 %v3616_v59, %v4350_v30 }
 0x58b   : > { %v2250_v5 = vpop.f32.mrf.mxu1 }
 0x58c   : > { %2282 = vst.msk [vmem:[%s4354_s22 + $0x168] sm:$0xff] %vm1452_vm0, %v2256_v27  ;;  %v2251_v60 = vadd.f32 %v4350_v30, %v2250_v5 }
 0x58d   : > { %v3619_v61 = vpop.f32.mrf.mxu1 }
 0x58e   : > { %2281 = vst.msk [vmem:[%s4354_s22 + $0x160] sm:$0xff] %vm1452_vm0, %v2251_v60  ;;  %v2266_v62 = vadd.f32 %v3619_v61, %v4350_v30  ;;  %2291 = sbr.rel (!%p4721_p11) target bundleno = 1497 (0x5d9), region = 48 }
 0x58f   : > { %v2260_v54 = vpop.f32.mrf.mxu1 }
 0x590   : > { %2284 = vst.msk [vmem:[%s4354_s22 + $0x178] sm:$0xff] %vm1452_vm0, %v2266_v62  ;;  %v2261_v63 = vadd.f32 %v4350_v30, %v2260_v54 }
 0x592   : > { %2283 = vst.msk [vmem:[%s4354_s22 + $0x170] sm:$0xff] %vm1452_vm0, %v2261_v63 }
 0x593   : > { %s4734_s30 = smov (!%p2294_p9, %s2293_s30), 48 }
 0x594   : > { %s2742_s10 = sshll.u32 %s4734_s30, 7 }
 0x595   : > { %p2745_p12 = scmp.eq.s32.totalorder %s2742_s10, 0 }
 0x596   : > { %3747 = sdivrem.u32 (!%p2745_p12), %s4734_s30, 48 }
 0x597   : > { %2302 = sbr.rel (%p2745_p12) target bundleno = 1497 (0x5d9), region = 52 }
 0x59f   : > { %s4548_s23 = spop.drf %3747 }
 0x5a0   : > { %p2746_p1 = scmp.le.s32.totalorder %s4548_s23, 0 }
 0x5a1   : > { %s4722_s16 = smov (!%p2746_p1), %s4542_s9  ;;  %s4723_s15 = smov (!%p2746_p1), %s4354_s22 }
 0x5a2   : > { %2656 = sbr.rel (%p2746_p1) target bundleno = 1472 (0x5c0), region = 140  ;;  %s4557_s11 = smov (!%p2746_p1), 0  }
 0x5a3   : > { %s4559_s12 = smov (!%p2746_p1), 0  }
 0x5a7 LB: >> { %v2461_v30 = vld [vmem:[%s3907_s15] sm:$0xff]  ;;  %v2463_v6 = vld [vmem:[%s3907_s15 + $0x8] sm:$0xff]  ;;  %v2465_v4 = vld [vmem:[%s3907_s15 + $0x10] sm:$0xff]  ;;  %s2557_s18 = sadd.s32 1, %s3911_s11  ;;  %s2455_s12 = sadd.s32 1, %s3915_s12   ;;  %s3915_s12 = sphi %s4559_s12, %s2455_s12   ;;  %s3911_s11 = sphi %s4557_s11, %s4726_s11   ;;  %s3907_s15 = sphi %s4723_s15, %s4725_s15   ;;  %s3903_s16 = sphi %s4722_s16, %s4724_s16  }
 0x5a8   : >> { %2462 = vst [vmem:[%s3903_s16] sm:$0xff] %v2461_v30  ;;  %2464 = vst [vmem:[%s3903_s16 + $0x8] sm:$0xff] %v2463_v6  ;;  %v2467_v45 = vld [vmem:[%s3907_s15 + $0x18] sm:$0xff]  ;;  %v2469_v11 = vld [vmem:[%s3907_s15 + $0x20] sm:$0xff]  ;;  %p2558_p2 = scmp.ge.s32.totalorder %s2557_s18, %s4548_s23  ;;  %p2454_p6 = scmp.ge.s32.totalorder %s2455_s12, %s4548_s23 }
 0x5a9   : >> { %2466 = vst [vmem:[%s3903_s16 + $0x10] sm:$0xff] %v2465_v4  ;;  %v2471_v7 = vld [vmem:[%s3907_s15 + $0x28] sm:$0xff]  ;;  %2468 = vst [vmem:[%s3903_s16 + $0x18] sm:$0xff] %v2467_v45  ;;  %v2473_v12 = vld [vmem:[%s3907_s15 + $0x30] sm:$0xff] }
 0x5aa   : >> { %2470 = vst [vmem:[%s3903_s16 + $0x20] sm:$0xff] %v2469_v11  ;;  %2472 = vst [vmem:[%s3903_s16 + $0x28] sm:$0xff] %v2471_v7  ;;  %v2475_v14 = vld [vmem:[%s3907_s15 + $0x38] sm:$0xff]  ;;  %v2477_v16 = vld [vmem:[%s3907_s15 + $0x40] sm:$0xff]  ;;  %s4736_s18 = smov (%p2558_p2, %s2557_s18), 0 }
 0x5ab   : >> { %2474 = vst [vmem:[%s3903_s16 + $0x30] sm:$0xff] %v2473_v12  ;;  %2476 = vst [vmem:[%s3903_s16 + $0x38] sm:$0xff] %v2475_v14  ;;  %v2479_v18 = vld [vmem:[%s3907_s15 + $0x48] sm:$0xff]  ;;  %v2481_v8 = vld [vmem:[%s3907_s15 + $0x50] sm:$0xff]  ;;  %s2560_s19 = smul.u32 384, %s4736_s18  ;;  %s4726_s11 = smov %s4736_s18 }
 0x5ac   : >> { %2478 = vst [vmem:[%s3903_s16 + $0x40] sm:$0xff] %v2477_v16  ;;  %v2483_v20 = vld [vmem:[%s3907_s15 + $0x58] sm:$0xff]  ;;  %2480 = vst [vmem:[%s3903_s16 + $0x48] sm:$0xff] %v2479_v18  ;;  %v2485_v21 = vld [vmem:[%s3907_s15 + $0x60] sm:$0xff] }
 0x5ad   : >> { %2482 = vst [vmem:[%s3903_s16 + $0x50] sm:$0xff] %v2481_v8  ;;  %2484 = vst [vmem:[%s3903_s16 + $0x58] sm:$0xff] %v2483_v20  ;;  %v2487_v9 = vld [vmem:[%s3907_s15 + $0x68] sm:$0xff]  ;;  %v2489_v22 = vld [vmem:[%s3907_s15 + $0x70] sm:$0xff]  ;;  %s4621_s25 = scalar_lea.vmem %s4354_s22, %s2560_s19 [#allocation7]   ;;  %s4624_s26 = scalar_lea.vmem %s4542_s9, %s2560_s19  }
 0x5ae   : >> { %2486 = vst [vmem:[%s3903_s16 + $0x60] sm:$0xff] %v2485_v21  ;;  %2488 = vst [vmem:[%s3903_s16 + $0x68] sm:$0xff] %v2487_v9  ;;  %v2491_v23 = vld [vmem:[%s3907_s15 + $0x78] sm:$0xff]  ;;  %v2493_v24 = vld [vmem:[%s3907_s15 + $0x80] sm:$0xff] }
 0x5af   : >> { %2490 = vst [vmem:[%s3903_s16 + $0x70] sm:$0xff] %v2489_v22  ;;  %v2495_v25 = vld [vmem:[%s3907_s15 + $0x88] sm:$0xff]  ;;  %2492 = vst [vmem:[%s3903_s16 + $0x78] sm:$0xff] %v2491_v23  ;;  %v2497_v10 = vld [vmem:[%s3907_s15 + $0x90] sm:$0xff] }
 0x5b0   : >> { %2494 = vst [vmem:[%s3903_s16 + $0x80] sm:$0xff] %v2493_v24  ;;  %2496 = vst [vmem:[%s3903_s16 + $0x88] sm:$0xff] %v2495_v25  ;;  %v2499_v26 = vld [vmem:[%s3907_s15 + $0x98] sm:$0xff]  ;;  %v2501_v28 = vld [vmem:[%s3907_s15 + $0xa0] sm:$0xff] }
 0x5b1   : >> { %2498 = vst [vmem:[%s3903_s16 + $0x90] sm:$0xff] %v2497_v10  ;;  %2500 = vst [vmem:[%s3903_s16 + $0x98] sm:$0xff] %v2499_v26  ;;  %v2503_v29 = vld [vmem:[%s3907_s15 + $0xa8] sm:$0xff]  ;;  %v2505_v13 = vld [vmem:[%s3907_s15 + $0xb0] sm:$0xff] }
 0x5b2   : >> { %2502 = vst [vmem:[%s3903_s16 + $0xa0] sm:$0xff] %v2501_v28  ;;  %v2507_v19 = vld [vmem:[%s3907_s15 + $0xb8] sm:$0xff]  ;;  %2504 = vst [vmem:[%s3903_s16 + $0xa8] sm:$0xff] %v2503_v29  ;;  %v2509_v32 = vld [vmem:[%s3907_s15 + $0xc0] sm:$0xff] }
 0x5b3   : >> { %2506 = vst [vmem:[%s3903_s16 + $0xb0] sm:$0xff] %v2505_v13  ;;  %2508 = vst [vmem:[%s3903_s16 + $0xb8] sm:$0xff] %v2507_v19  ;;  %v2511_v33 = vld [vmem:[%s3907_s15 + $0xc8] sm:$0xff]  ;;  %v2513_v34 = vld [vmem:[%s3907_s15 + $0xd0] sm:$0xff] }
 0x5b4   : >> { %2510 = vst [vmem:[%s3903_s16 + $0xc0] sm:$0xff] %v2509_v32  ;;  %2512 = vst [vmem:[%s3903_s16 + $0xc8] sm:$0xff] %v2511_v33  ;;  %v2515_v15 = vld [vmem:[%s3907_s15 + $0xd8] sm:$0xff]  ;;  %v2517_v35 = vld [vmem:[%s3907_s15 + $0xe0] sm:$0xff] }
 0x5b5   : >> { %2514 = vst [vmem:[%s3903_s16 + $0xd0] sm:$0xff] %v2513_v34  ;;  %v2519_v36 = vld [vmem:[%s3907_s15 + $0xe8] sm:$0xff]  ;;  %2516 = vst [vmem:[%s3903_s16 + $0xd8] sm:$0xff] %v2515_v15  ;;  %v2521_v37 = vld [vmem:[%s3907_s15 + $0xf0] sm:$0xff] }
 0x5b6   : >> { %2518 = vst [vmem:[%s3903_s16 + $0xe0] sm:$0xff] %v2517_v35  ;;  %2520 = vst [vmem:[%s3903_s16 + $0xe8] sm:$0xff] %v2519_v36  ;;  %v2523_v38 = vld [vmem:[%s3907_s15 + $0xf8] sm:$0xff]  ;;  %v2525_v17 = vld [vmem:[%s3907_s15 + $0x100] sm:$0xff] }
 0x5b7   : >> { %2522 = vst [vmem:[%s3903_s16 + $0xf0] sm:$0xff] %v2521_v37  ;;  %2524 = vst [vmem:[%s3903_s16 + $0xf8] sm:$0xff] %v2523_v38  ;;  %v2527_v39 = vld [vmem:[%s3907_s15 + $0x108] sm:$0xff]  ;;  %v2529_v40 = vld [vmem:[%s3907_s15 + $0x110] sm:$0xff] }
 0x5b8   : >> { %2526 = vst [vmem:[%s3903_s16 + $0x100] sm:$0xff] %v2525_v17  ;;  %v2531_v31 = vld [vmem:[%s3907_s15 + $0x118] sm:$0xff]  ;;  %2528 = vst [vmem:[%s3903_s16 + $0x108] sm:$0xff] %v2527_v39  ;;  %v2533_v41 = vld [vmem:[%s3907_s15 + $0x120] sm:$0xff] }
 0x5b9   : >> { %2530 = vst [vmem:[%s3903_s16 + $0x110] sm:$0xff] %v2529_v40  ;;  %2532 = vst [vmem:[%s3903_s16 + $0x118] sm:$0xff] %v2531_v31  ;;  %v2535_v42 = vld [vmem:[%s3907_s15 + $0x128] sm:$0xff]  ;;  %v2537_v43 = vld [vmem:[%s3907_s15 + $0x130] sm:$0xff] }
 0x5ba   : >> { %2534 = vst [vmem:[%s3903_s16 + $0x120] sm:$0xff] %v2533_v41  ;;  %2536 = vst [vmem:[%s3903_s16 + $0x128] sm:$0xff] %v2535_v42  ;;  %v2539_v44 = vld [vmem:[%s3907_s15 + $0x138] sm:$0xff]  ;;  %v2541_v46 = vld [vmem:[%s3907_s15 + $0x140] sm:$0xff] }
 0x5bb   : >> { %2538 = vst [vmem:[%s3903_s16 + $0x130] sm:$0xff] %v2537_v43  ;;  %v2543_v47 = vld [vmem:[%s3907_s15 + $0x148] sm:$0xff]  ;;  %2540 = vst [vmem:[%s3903_s16 + $0x138] sm:$0xff] %v2539_v44  ;;  %v2545_v48 = vld [vmem:[%s3907_s15 + $0x150] sm:$0xff]  ;;  %2457 = sbr.rel (!%p2454_p6) target bundleno = 1447 (0x5a7), region = 146 }
 0x5bc   : >> { %2542 = vst [vmem:[%s3903_s16 + $0x140] sm:$0xff] %v2541_v46  ;;  %2544 = vst [vmem:[%s3903_s16 + $0x148] sm:$0xff] %v2543_v47  ;;  %v2547_v0 = vld [vmem:[%s3907_s15 + $0x158] sm:$0xff]  ;;  %v2549_v49 = vld [vmem:[%s3907_s15 + $0x160] sm:$0xff] }
 0x5bd   : >> { %2546 = vst [vmem:[%s3903_s16 + $0x150] sm:$0xff] %v2545_v48  ;;  %2548 = vst [vmem:[%s3903_s16 + $0x158] sm:$0xff] %v2547_v0  ;;  %v2551_v50 = vld [vmem:[%s3907_s15 + $0x168] sm:$0xff]  ;;  %v2553_v51 = vld [vmem:[%s3907_s15 + $0x170] sm:$0xff] }
 0x5be   : >> { %2550 = vst [vmem:[%s3903_s16 + $0x160] sm:$0xff] %v2549_v49  ;;  %v2555_v52 = vld [vmem:[%s3907_s15 + $0x178] sm:$0xff]  ;;  %2552 = vst [vmem:[%s3903_s16 + $0x168] sm:$0xff] %v2551_v50  ;;  %s4725_s15 = smov %s4621_s25 }
 0x5bf   : >> { %2554 = vst [vmem:[%s3903_s16 + $0x170] sm:$0xff] %v2553_v51  ;;  %2556 = vst [vmem:[%s3903_s16 + $0x178] sm:$0xff] %v2555_v52  ;;  %s4724_s16 = smov %s4624_s26 }
 0x5c0 PF: > { %3749 = sdivrem.u32 %s4734_s30, 48 }
 0x5c1   : > { %s2747_s27 = smul.u32 384, %s4548_s23 }
 0x5c3   : > { %s2568_s29 = scalar_lea.vmem %s4354_s22, %s2747_s27 [#allocation7]   ;;  %s2570_s21 = scalar_lea.vmem %s4542_s9, %s2747_s27  }
 0x5c9   : > { %s3750_s5 = spop.drf %3749 }
 0x5ca   : > { %p2749_p3 = scmp.le.s32.totalorder %s3750_s5, 0 }
 0x5cb   : > { %s3917_s6 = smov (!%p2749_p3), %s2570_s21   ;;  %s3921_s8 = smov (!%p2749_p3), %s2568_s29  }
 0x5cc   : > { %2670 = sbr.rel (%p2749_p3) target bundleno = 1497 (0x5d9), region = 151  ;;  %s3925_s24 = smov (!%p2749_p3), 0  }
 0x5cd   : > { %s3929_s28 = smov (!%p2749_p3), 0  }
 0x5d1 LB: >> { %v2580_v1 = vld [vmem:[%s3923_s8] sm:$0xff]  ;;  %s2582_s4 = sadd.s32 1, %s3927_s24  ;;  %s2574_s28 = sadd.s32 1, %s3931_s28   ;;  %s3931_s28 = sphi %s3929_s28, %s2574_s28   ;;  %s3927_s24 = sphi %s3925_s24, %s3926_s24   ;;  %s3923_s8 = sphi %s3921_s8, %s2587_s8   ;;  %s3919_s6 = sphi %s3917_s6, %s2588_s6  }
 0x5d2   : >> { %2581 = vst [vmem:[%s3919_s6] sm:$0xff] %v2580_v1  ;;  %p2583_p7 = scmp.ge.s32.totalorder %s2582_s4, %s3750_s5  ;;  %p2573_p5 = scmp.ge.s32.totalorder %s2574_s28, %s3750_s5 }
 0x5d4   : >> { %s4738_s4 = smov (%p2583_p7, %s2582_s4), 0  ;;  %2576 = sbr.rel (!%p2573_p5) target bundleno = 1489 (0x5d1), region = 157 }
 0x5d5   : >> { %s2750_s22 = sshll.u32 %s4738_s4, 3  ;;  %s3926_s24 = smov %s4738_s4  }
 0x5d6   : >> { %s2587_s8 = scalar_lea.vmem %s2568_s29, %s2750_s22 [#allocation7]   ;;  %s2588_s6 = scalar_lea.vmem %s2570_s21, %s2750_s22  }
 0x5d9 PF: > { %p14_p8 = scmp.ge.s32.totalorder %s3984_s17, 4   ;;  %s4727_s12 = smov %s3891_s13 }
 0x5da   : > { %s4728_s13 = smov %s3895_s14  ;;  %s4729_s14 = smov %s3994_s20 }
 0x5db   : > { %s4730_s15 = smov %s3984_s17  ;;  %16 = sbr.rel (!%p14_p8) target bundleno = 4 (0x4), region = 168 }
 0x5e0   :  { %2604 = vsyncpa [#allocation3], 1 }
 0x5e1   :  { %2606 = vsyncpa [#allocation3 + $0x1], 1 }
 0x5e2   :  { %2607 = vsyncpa [#allocation5], 1 }

</bundles_post_ra>
